<compile_context>
chip_gen: v7x
topology: tpu7x:2x2x1
jax: 0.10.0
libtpu: 0.0.40
codegen_flags: <defaults>
</compile_context>

<pallas_src>
import jax
import jax.numpy as jnp
from jax import lax
from jax.experimental import pallas as pl
from jax.experimental.pallas import tpu as pltpu

# ----- small synthetic MambaConfig -----
VOCAB = 64
HIDDEN = 32
D_STATE = 8
D_CONV = 4
EXPAND = 2
D_INNER = EXPAND * HIDDEN            # 64
DT_RANK = (HIDDEN + 15) // 16        # 2
NUM_LAYERS = 2
BATCH = 2
SEQ = 8
EPS = 1e-5
VOCAB_PAD = 128                      # lane-dense logits store; sliced back to VOCAB outside

# ----- packed per-layer "small params" slab row layout ([SLAB_ROWS, D_INNER]) -----
_ROW_WB = 0                              # rows  0.. 8 : x_proj B slice   [D_STATE, D_INNER]
_ROW_WC = _ROW_WB + D_STATE              # rows  8..16 : x_proj C slice
_ROW_A = _ROW_WC + D_STATE               # rows 16..24 : A = -exp(A_log)
_ROW_CONVW = _ROW_A + D_STATE            # rows 24..28 : depthwise conv weight [D_CONV, D_INNER]
_ROW_CONVB = _ROW_CONVW + D_CONV         # row  28     : conv bias
_ROW_DTB = _ROW_CONVB + 1                # row  29     : dt_proj bias
_ROW_D = _ROW_DTB + 1                    # row  30     : D (skip term)
_ROW_NORM = _ROW_D + 1                   # row  31     : RMSNorm weight (first HIDDEN lanes valid)
SLAB_ROWS = 32


# ---------------------------------------------------------------------------
# Fused decoder kernel: grid over layers, hidden carried in VMEM scratch,
# final RMSNorm + tied LM head emitted on the last grid step.
# ---------------------------------------------------------------------------
def _mamba_decoder_kernel(emb_ref, in_w_ref, wdt_ref, out_w_ref, slab_ref,
                          fnorm_ref, emb_t_ref, o_ref, hid_scr, y_scr):
    f32 = jnp.float32
    layer = pl.program_id(0)
    M = emb_ref.shape[0]                 # B*L rows (batch folded into the tile)
    L = SEQ
    n_batch = M // L

    @pl.when(layer == 0)
    def _():
        hid_scr[...] = emb_ref[...]      # seed the carried hidden state from the embedding

    hid = hid_scr[...]                                               # [M, H]

    # --- unpack the per-layer small-param slab (one DMA for ~10 tiny tensors) ---
    slab = slab_ref[...]                                             # [32, D_INNER]
    w_b = slab[_ROW_WB:_ROW_WB + D_STATE, :]                         # [N, D_INNER]
    w_c = slab[_ROW_WC:_ROW_WC + D_STATE, :]                         # [N, D_INNER]
    A = slab[_ROW_A:_ROW_A + D_STATE, :]                             # [N, D_INNER]  (= -exp(A_log))
    conv_w = slab[_ROW_CONVW:_ROW_CONVW + D_CONV, :]                 # [D_CONV, D_INNER]
    conv_b = slab[_ROW_CONVB:_ROW_CONVB + 1, :]                      # [1, D_INNER]
    dtproj_b = slab[_ROW_DTB:_ROW_DTB + 1, :]                        # [1, D_INNER]
    d_skip = slab[_ROW_D:_ROW_D + 1, :]                              # [1, D_INNER]
    norm_w = slab[_ROW_NORM:_ROW_NORM + 1, :HIDDEN]                  # [1, H]

    # --- RMSNorm (pre-norm) ---
    var = jnp.mean(hid * hid, axis=-1, keepdims=True)
    xn = hid * lax.rsqrt(var + EPS) * norm_w

    # --- fused in_proj: one lane-dense [H, 2*D_INNER]=128-wide matmul, cheap lane split ---
    xz = jnp.dot(xn, in_w_ref[...], preferred_element_type=f32)      # [M, 2*D_INNER]
    x = xz[:, :D_INNER]
    z = xz[:, D_INNER:]

    # --- causal depthwise conv + SiLU (batch folded into rows; mask within-sequence) ---
    pos = lax.broadcasted_iota(jnp.int32, (M, D_INNER), 0) % L       # position within sequence
    x_pad = jnp.concatenate([jnp.zeros((D_CONV - 1, D_INNER), f32), x], axis=0)
    acc = jnp.zeros((M, D_INNER), f32) + conv_b
    for k in range(D_CONV):                                          # tiny static unroll
        s = D_CONV - 1 - k                                           # shift for tap k
        xs = x_pad[k:k + M, :]                                       # row r holds x[r - s]
        if s:
            xs = jnp.where(pos < s, 0.0, xs)                         # causal + batch-boundary mask
        acc = acc + xs * conv_w[k:k + 1, :]
    xconv = acc * jax.nn.sigmoid(acc)                                # [M, D_INNER]

    # --- fused dt projection (x_proj dt-slice @ dt_proj folded into one matmul at init) ---
    dt = jnp.dot(xconv, wdt_ref[...], preferred_element_type=f32) + dtproj_b
    dt = jnp.maximum(dt, 0.0) + jnp.log1p(jnp.exp(-jnp.abs(dt)))     # stable softplus
    dtx = dt * xconv                                                 # [M, D_INNER]

    # --- B / C projections ---
    Bm = jnp.einsum("md,nd->mn", xconv, w_b, preferred_element_type=f32)   # [M, N]
    CmT = jnp.einsum("nd,md->nm", w_c, xconv, preferred_element_type=f32)  # [N, M]

    # --- selective scan: dA and input-injection term precomputed in bulk; the serial
    #     per-step work is one FMA + one XLU sublane reduce + a row store into scratch.
    for b in range(n_batch):                                         # static (n_batch small)
        r0 = b * L
        dt_b = dt[r0:r0 + L, :]
        dA_b = jnp.exp(dt_b[:, None, :] * A[None, :, :])             # [L, N, D_INNER] (bulk EUP)
        u_b = Bm[r0:r0 + L, :, None] * dtx[r0:r0 + L, None, :]       # [L, N, D_INNER] (bulk VPU)
        h = jnp.zeros((D_STATE, D_INNER), f32)
        for t in range(L):                                           # static unroll (L small)
            h = dA_b[t] * h + u_b[t]                                 # recurrence critical path
            y_t = jnp.sum(CmT[:, r0 + t:r0 + t + 1] * h, axis=0, keepdims=True)  # [1, D_INNER]
            y_scr[pl.ds(r0 + t, 1), :] = y_t
    y = y_scr[...] + d_skip * xconv

    # --- SiLU gate, out_proj, residual add ---
    y = y * (z * jax.nn.sigmoid(z))
    new_hid = hid + jnp.dot(y, out_w_ref[...], preferred_element_type=f32)     # [M, H]
    hid_scr[...] = new_hid

    # --- final RMSNorm + tied LM head (lane-dense 128-wide output), last layer only ---
    @pl.when(layer == pl.num_programs(0) - 1)
    def _():
        v = jnp.mean(new_hid * new_hid, axis=-1, keepdims=True)
        fn = new_hid * lax.rsqrt(v + EPS) * fnorm_ref[...]
        o_ref[...] = jnp.dot(fn, emb_t_ref[...], preferred_element_type=f32)   # [M, VOCAB_PAD]


def mamba_decoder_and_head(emb_hidden, stacked, final_norm_w, emb_t_pad):
    """emb_hidden: [B*L, H] f32; stacked: per-layer weights stacked on a leading layer axis."""
    M, H = emb_hidden.shape
    return pl.pallas_call(
        _mamba_decoder_kernel,
        out_shape=jax.ShapeDtypeStruct((M, VOCAB_PAD), jnp.float32),
        grid=(NUM_LAYERS,),
        in_specs=[
            pl.BlockSpec((M, H), lambda l: (0, 0)),                          # embedded tokens
            pl.BlockSpec((None, H, 2 * D_INNER), lambda l: (l, 0, 0)),       # in_proj^T (x | z)
            pl.BlockSpec((None, D_INNER, D_INNER), lambda l: (l, 0, 0)),     # fused dt projection
            pl.BlockSpec((None, D_INNER, H), lambda l: (l, 0, 0)),           # out_proj^T
            pl.BlockSpec((None, SLAB_ROWS, D_INNER), lambda l: (l, 0, 0)),   # packed small params
            pl.BlockSpec((1, H), lambda l: (0, 0)),                          # final RMSNorm weight
            pl.BlockSpec((H, VOCAB_PAD), lambda l: (0, 0)),                  # tied LM head (padded)
        ],
        out_specs=pl.BlockSpec((M, VOCAB_PAD), lambda l: (0, 0)),
        scratch_shapes=[
            pltpu.VMEM((M, H), jnp.float32),        # hidden carried across layers (no HBM bounce)
            pltpu.VMEM((M, D_INNER), jnp.float32),  # per-layer scan output rows
        ],
        compiler_params=pltpu.CompilerParams(dimension_semantics=("arbitrary",)),
    )(emb_hidden, stacked["in_w"], stacked["wdt"], stacked["out_w"],
      stacked["slab"], final_norm_w, emb_t_pad)


# ---------------------------------------------------------------------------
# Parameters (deterministic synthetic init, mirroring __init__ / _init_weights).
# Linear weights are generated in torch layout, then pre-transposed / pre-fused /
# pre-packed so the kernel never emits per-call transposes, degenerate DT_RANK
# matmuls, zero-bias adds, or A = -exp(A_log) recomputation.
# ---------------------------------------------------------------------------
def init_params(key):
    keys = jax.random.split(key, 1 + NUM_LAYERS)
    emb = 0.02 * jax.random.normal(keys[0], (VOCAB, HIDDEN), jnp.float32)   # nn.Embedding init

    in_w, wdt, out_w, slab = [], [], [], []
    for l in range(NUM_LAYERS):
        k = jax.random.split(keys[1 + l], 6)
        in_proj_w = jax.random.normal(k[0], (2 * D_INNER, HIDDEN)) / jnp.sqrt(HIDDEN)
        conv_w = jax.random.normal(k[1], (D_CONV, D_INNER)) / jnp.sqrt(D_CONV)
        conv_b = jnp.zeros((D_INNER,), jnp.float32)
        x_proj_w = jax.random.normal(k[2], (DT_RANK + 2 * D_STATE, D_INNER)) / jnp.sqrt(D_INNER)
        dt_proj_w = jax.random.normal(k[3], (D_INNER, DT_RANK)) / jnp.sqrt(DT_RANK)
        dt_vals = jnp.exp(jax.random.uniform(k[4], (D_INNER,))
                          * (jnp.log(0.1) - jnp.log(0.001)) + jnp.log(0.001))
        dt_proj_b = jnp.log(jnp.expm1(dt_vals))          # inverse softplus (dt bias, _no_reinit)
        A_log = jnp.log(jnp.broadcast_to(
            jnp.arange(1, D_STATE + 1, dtype=jnp.float32)[:, None], (D_STATE, D_INNER)))
        Dp = jnp.ones((D_INNER,), jnp.float32)
        # out_proj.weight: kaiming-style uniform rescaled by 1/sqrt(num_layers) (_init_weights)
        out_proj_w = (jax.random.uniform(k[5], (HIDDEN, D_INNER), minval=-1.0, maxval=1.0)
                      / jnp.sqrt(D_INNER) / jnp.sqrt(NUM_LAYERS))

        in_w.append(jnp.transpose(in_proj_w).astype(jnp.float32))            # [H, 2*D_INNER]
        # fused dt path: dt = xconv @ (x_proj_dt^T @ dt_proj^T) + b
        wdt.append((jnp.transpose(x_proj_w[:DT_RANK])
                    @ jnp.transpose(dt_proj_w)).astype(jnp.float32))          # [D_INNER, D_INNER]
        out_w.append(jnp.transpose(out_proj_w).astype(jnp.float32))           # [D_INNER, H]

        slab_l = jnp.zeros((SLAB_ROWS, D_INNER), jnp.float32)
        slab_l = slab_l.at[_ROW_WB:_ROW_WB + D_STATE].set(x_proj_w[DT_RANK:DT_RANK + D_STATE])
        slab_l = slab_l.at[_ROW_WC:_ROW_WC + D_STATE].set(x_proj_w[DT_RANK + D_STATE:])
        slab_l = slab_l.at[_ROW_A:_ROW_A + D_STATE].set(-jnp.exp(A_log))      # precomputed A
        slab_l = slab_l.at[_ROW_CONVW:_ROW_CONVW + D_CONV].set(conv_w)
        slab_l = slab_l.at[_ROW_CONVB].set(conv_b)
        slab_l = slab_l.at[_ROW_DTB].set(dt_proj_b)
        slab_l = slab_l.at[_ROW_D].set(Dp)
        slab_l = slab_l.at[_ROW_NORM, :HIDDEN].set(jnp.ones((HIDDEN,), jnp.float32))
        slab.append(slab_l)

    stacked = dict(in_w=jnp.stack(in_w), wdt=jnp.stack(wdt),
                   out_w=jnp.stack(out_w), slab=jnp.stack(slab))
    # tied LM head (share_embeddings_and_output_weights=True), pre-transposed and
    # lane-padded to 128 so the kernel's only HBM store is unmasked lane-dense.
    emb_t_pad = jnp.zeros((HIDDEN, VOCAB_PAD), jnp.float32).at[:, :VOCAB].set(jnp.transpose(emb))
    return dict(embedding=emb, stacked=stacked,
                final_norm_w=jnp.ones((1, HIDDEN), jnp.float32),
                emb_t_pad=emb_t_pad)


# ---------------------------------------------------------------------------
# Forward pass (MambaModel.forward): embedding -> decoder -> tied LM head
# ---------------------------------------------------------------------------
def mamba_model_forward(params, input_ids):
    B_, L = input_ids.shape
    assert L == SEQ
    hidden = params["embedding"][input_ids].reshape(B_ * L, HIDDEN)   # gather (JAX glue)
    logits = mamba_decoder_and_head(hidden, params["stacked"],
                                    params["final_norm_w"], params["emb_t_pad"])
    return logits[:, :VOCAB].reshape(B_, L, VOCAB)


if __name__ == "__main__":
    key = jax.random.PRNGKey(0)
    pkey, ikey = jax.random.split(key)
    params = init_params(pkey)
    input_ids = jax.random.randint(ikey, (BATCH, SEQ), 0, VOCAB, dtype=jnp.int32)
    logits = jax.jit(mamba_model_forward)(params, input_ids)
    jax.block_until_ready(logits)
    assert logits.shape == (BATCH, SEQ, VOCAB), logits.shape
    assert bool(jnp.all(jnp.isfinite(logits)))
    print("KERNEL_OK")
</pallas_src>

<mosaic_0001>
module attributes {stable_mosaic.version = 11 : i64} {
  func.func @_mamba_decoder_kernel(%arg0: i32, %arg1: memref<16x32xf32, #tpu.memory_space<vmem>>, %arg2: memref<1x32x128xf32, #tpu.memory_space<vmem>>, %arg3: memref<1x64x64xf32, #tpu.memory_space<vmem>>, %arg4: memref<1x64x32xf32, #tpu.memory_space<vmem>>, %arg5: memref<1x32x64xf32, #tpu.memory_space<vmem>>, %arg6: memref<1x32xf32, #tpu.memory_space<vmem>>, %arg7: memref<32x128xf32, #tpu.memory_space<vmem>>, %arg8: memref<16x128xf32, #tpu.memory_space<vmem>>, %arg9: memref<16x32xf32, #tpu.memory_space<vmem>>, %arg10: memref<16x64xf32, #tpu.memory_space<vmem>>) attributes {dimension_semantics = [#tpu.dimension_semantics<arbitrary>], iteration_bounds = array<i64: 2>, scalar_prefetch = 0 : i64, scratch_operands = 2 : i64, tpu.core_type = #tpu.core_type<tc>, window_params = [{pipeline_mode = #tpu.pipeline_mode<synchronous>, transform_indices = @transform_0, window_bounds = array<i64: 16, 32>}, {transform_indices = @transform_1, window_bounds = array<i64: 1, 32, 128>}, {transform_indices = @transform_2, window_bounds = array<i64: 1, 64, 64>}, {transform_indices = @transform_3, window_bounds = array<i64: 1, 64, 32>}, {transform_indices = @transform_4, window_bounds = array<i64: 1, 32, 64>}, {pipeline_mode = #tpu.pipeline_mode<synchronous>, transform_indices = @transform_5, window_bounds = array<i64: 1, 32>}, {pipeline_mode = #tpu.pipeline_mode<synchronous>, transform_indices = @transform_6, window_bounds = array<i64: 32, 128>}, {pipeline_mode = #tpu.pipeline_mode<synchronous>, transform_indices = @transform_7, window_bounds = array<i64: 16, 128>}]} {
    %c0_i32 = arith.constant 0 : i32
    %0 = arith.cmpi eq, %arg0, %c0_i32 : i32
    %1 = arith.extui %0 : i1 to i32
    %c0_i32_0 = arith.constant 0 : i32
    %2 = arith.cmpi ne, %1, %c0_i32_0 : i32
    scf.if %2 {
      %c0_76 = arith.constant 0 : index
      %c0_77 = arith.constant 0 : index
      %348 = vector.load %arg1[%c0_76, %c0_77] : memref<16x32xf32, #tpu.memory_space<vmem>>, vector<16x32xf32>
      %c0_78 = arith.constant 0 : index
      %c0_79 = arith.constant 0 : index
      %349 = vector.load %arg9[%c0_78, %c0_79] : memref<16x32xf32, #tpu.memory_space<vmem>>, vector<16x32xf32>
      tpu.vector_store %arg9[%c0_78, %c0_79], %348 {strides = array<i32>} : memref<16x32xf32, #tpu.memory_space<vmem>>, vector<16x32xf32>,
    } else {
    }
    %c0 = arith.constant 0 : index
    %c0_1 = arith.constant 0 : index
    %3 = vector.load %arg9[%c0, %c0_1] : memref<16x32xf32, #tpu.memory_space<vmem>>, vector<16x32xf32>
    %c0_2 = arith.constant 0 : index
    %c0_3 = arith.constant 0 : index
    %c0_4 = arith.constant 0 : index
    %4 = vector.load %arg5[%c0_2, %c0_3, %c0_4] : memref<1x32x64xf32, #tpu.memory_space<vmem>>, vector<1x32x64xf32>
    %5 = vector.shape_cast %4 : vector<1x32x64xf32> to vector<32x64xf32>
    %6 = vector.extract_strided_slice %5 {offsets = [0, 0], sizes = [8, 64], strides = [1, 1]} : vector<32x64xf32> to vector<8x64xf32>
    %7 = vector.extract_strided_slice %5 {offsets = [8, 0], sizes = [8, 64], strides = [1, 1]} : vector<32x64xf32> to vector<8x64xf32>
    %8 = vector.extract_strided_slice %5 {offsets = [16, 0], sizes = [8, 64], strides = [1, 1]} : vector<32x64xf32> to vector<8x64xf32>
    %9 = vector.extract_strided_slice %5 {offsets = [24, 0], sizes = [4, 64], strides = [1, 1]} : vector<32x64xf32> to vector<4x64xf32>
    %10 = vector.extract_strided_slice %5 {offsets = [28, 0], sizes = [1, 64], strides = [1, 1]} : vector<32x64xf32> to vector<1x64xf32>
    %11 = vector.extract_strided_slice %5 {offsets = [29, 0], sizes = [1, 64], strides = [1, 1]} : vector<32x64xf32> to vector<1x64xf32>
    %12 = vector.extract_strided_slice %5 {offsets = [30, 0], sizes = [1, 64], strides = [1, 1]} : vector<32x64xf32> to vector<1x64xf32>
    %13 = vector.extract_strided_slice %5 {offsets = [31, 0], sizes = [1, 32], strides = [1, 1]} : vector<32x64xf32> to vector<1x32xf32>
    %14 = arith.mulf %3, %3 : vector<16x32xf32>
    %cst = arith.constant dense<0.000000e+00> : vector<16xf32>
    %15 = vector.multi_reduction <add>, %14, %cst [1] : vector<16x32xf32> to vector<16xf32>
    %16 = vector.shape_cast %15 : vector<16xf32> to vector<16x1xf32>
    %cst_5 = arith.constant 3.200000e+01 : f32
    %17 = vector.broadcast %cst_5 : f32 to vector<16x1xf32>
    %18 = arith.divf %16, %17 : vector<16x1xf32>
    %cst_6 = arith.constant 9.99999974E-6 : f32
    %19 = vector.broadcast %cst_6 : f32 to vector<16x1xf32>
    %20 = arith.addf %18, %19 : vector<16x1xf32>
    %21 = math.rsqrt %20 : vector<16x1xf32>
    %22 = vector.broadcast %21 : vector<16x1xf32> to vector<16x32xf32>
    %23 = arith.mulf %3, %22 : vector<16x32xf32>
    %24 = vector.broadcast %13 : vector<1x32xf32> to vector<16x32xf32>
    %25 = arith.mulf %23, %24 : vector<16x32xf32>
    %c0_7 = arith.constant 0 : index
    %c0_8 = arith.constant 0 : index
    %c0_9 = arith.constant 0 : index
    %26 = vector.load %arg2[%c0_7, %c0_8, %c0_9] : memref<1x32x128xf32, #tpu.memory_space<vmem>>, vector<1x32x128xf32>
    %27 = vector.shape_cast %26 : vector<1x32x128xf32> to vector<32x128xf32>
    %cst_10 = arith.constant dense<0.000000e+00> : vector<16x128xf32>
    %28 = tpu.matmul %25, %27, %cst_10 {dimension_numbers = #tpu.dot_dimension_numbers<[1], [0], [0], [1], [0, 0, 1, 1], [], []>} : vector<16x32xf32>, vector<32x128xf32>, vector<16x128xf32> -> vector<16x128xf32>
    %29 = vector.extract_strided_slice %28 {offsets = [0, 0], sizes = [16, 64], strides = [1, 1]} : vector<16x128xf32> to vector<16x64xf32>
    %30 = vector.extract_strided_slice %28 {offsets = [0, 64], sizes = [16, 64], strides = [1, 1]} : vector<16x128xf32> to vector<16x64xf32>
    %31 = tpu.iota {dimensions = array<i32: 0>} : vector<16x64xi32>
    %c8_i32 = arith.constant 8 : i32
    %c0_i32_11 = arith.constant 0 : i32
    %32 = arith.cmpi eq, %c8_i32, %c0_i32_11 : i32
    %c1_i32 = arith.constant 1 : i32
    %33 = arith.select %32, %c1_i32, %c8_i32 : i32
    %34 = vector.broadcast %33 : i32 to vector<16x64xi32>
    %35 = arith.remsi %31, %34 : vector<16x64xi32>
    %c0_i32_12 = arith.constant 0 : i32
    %36 = vector.broadcast %c0_i32_12 : i32 to vector<16x64xi32>
    %37 = arith.cmpi ne, %35, %36 : vector<16x64xi32>
    %c0_i32_13 = arith.constant 0 : i32
    %38 = vector.broadcast %c0_i32_13 : i32 to vector<16x64xi32>
    %39 = arith.cmpi slt, %35, %38 : vector<16x64xi32>
    %c0_i32_14 = arith.constant 0 : i32
    %40 = arith.cmpi slt, %33, %c0_i32_14 : i32
    %41 = vector.broadcast %40 : i1 to vector<16x64xi1>
    %42 = vector.broadcast %41 : vector<16x64xi1> to vector<16x64xi1>
    %43 = arith.xori %39, %42 : vector<16x64xi1>
    %44 = arith.andi %43, %37 : vector<16x64xi1>
    %45 = vector.broadcast %33 : i32 to vector<16x64xi32>
    %46 = arith.addi %35, %45 : vector<16x64xi32>
    %47 = arith.select %44, %46, %35 : vector<16x64xi1>, vector<16x64xi32>
    %cst_15 = arith.constant 0.000000e+00 : f32
    %48 = vector.broadcast %cst_15 : f32 to vector<3x64xf32>
    %49 = tpu.concatenate %48, %29 in 0 : vector<3x64xf32>, vector<16x64xf32> -> vector<19x64xf32>
    %cst_16 = arith.constant 0.000000e+00 : f32
    %50 = vector.broadcast %cst_16 : f32 to vector<16x64xf32>
    %51 = vector.broadcast %10 : vector<1x64xf32> to vector<16x64xf32>
    %52 = arith.addf %50, %51 : vector<16x64xf32>
    %53 = vector.extract_strided_slice %49 {offsets = [0, 0], sizes = [16, 64], strides = [1, 1]} : vector<19x64xf32> to vector<16x64xf32>
    %c3_i32 = arith.constant 3 : i32
    %54 = vector.broadcast %c3_i32 : i32 to vector<16x64xi32>
    %55 = arith.cmpi slt, %47, %54 : vector<16x64xi32>
    %cst_17 = arith.constant 0.000000e+00 : f32
    %56 = vector.broadcast %cst_17 : f32 to vector<16x64xf32>
    %57 = arith.select %55, %56, %53 : vector<16x64xi1>, vector<16x64xf32>
    %58 = vector.extract_strided_slice %9 {offsets = [0, 0], sizes = [1, 64], strides = [1, 1]} : vector<4x64xf32> to vector<1x64xf32>
    %59 = vector.broadcast %58 : vector<1x64xf32> to vector<16x64xf32>
    %60 = arith.mulf %57, %59 : vector<16x64xf32>
    %61 = arith.addf %52, %60 : vector<16x64xf32>
    %62 = vector.extract_strided_slice %49 {offsets = [1, 0], sizes = [16, 64], strides = [1, 1]} : vector<19x64xf32> to vector<16x64xf32>
    %c2_i32 = arith.constant 2 : i32
    %63 = vector.broadcast %c2_i32 : i32 to vector<16x64xi32>
    %64 = arith.cmpi slt, %47, %63 : vector<16x64xi32>
    %cst_18 = arith.constant 0.000000e+00 : f32
    %65 = vector.broadcast %cst_18 : f32 to vector<16x64xf32>
    %66 = arith.select %64, %65, %62 : vector<16x64xi1>, vector<16x64xf32>
    %67 = vector.extract_strided_slice %9 {offsets = [1, 0], sizes = [1, 64], strides = [1, 1]} : vector<4x64xf32> to vector<1x64xf32>
    %68 = vector.broadcast %67 : vector<1x64xf32> to vector<16x64xf32>
    %69 = arith.mulf %66, %68 : vector<16x64xf32>
    %70 = arith.addf %61, %69 : vector<16x64xf32>
    %71 = vector.extract_strided_slice %49 {offsets = [2, 0], sizes = [16, 64], strides = [1, 1]} : vector<19x64xf32> to vector<16x64xf32>
    %c1_i32_19 = arith.constant 1 : i32
    %72 = vector.broadcast %c1_i32_19 : i32 to vector<16x64xi32>
    %73 = arith.cmpi slt, %47, %72 : vector<16x64xi32>
    %cst_20 = arith.constant 0.000000e+00 : f32
    %74 = vector.broadcast %cst_20 : f32 to vector<16x64xf32>
    %75 = arith.select %73, %74, %71 : vector<16x64xi1>, vector<16x64xf32>
    %76 = vector.extract_strided_slice %9 {offsets = [2, 0], sizes = [1, 64], strides = [1, 1]} : vector<4x64xf32> to vector<1x64xf32>
    %77 = vector.broadcast %76 : vector<1x64xf32> to vector<16x64xf32>
    %78 = arith.mulf %75, %77 : vector<16x64xf32>
    %79 = arith.addf %70, %78 : vector<16x64xf32>
    %80 = vector.extract_strided_slice %49 {offsets = [3, 0], sizes = [16, 64], strides = [1, 1]} : vector<19x64xf32> to vector<16x64xf32>
    %81 = vector.extract_strided_slice %9 {offsets = [3, 0], sizes = [1, 64], strides = [1, 1]} : vector<4x64xf32> to vector<1x64xf32>
    %82 = vector.broadcast %81 : vector<1x64xf32> to vector<16x64xf32>
    %83 = arith.mulf %80, %82 : vector<16x64xf32>
    %84 = arith.addf %79, %83 : vector<16x64xf32>
    %85 = arith.negf %84 : vector<16x64xf32>
    %86 = math.exp %85 : vector<16x64xf32>
    %cst_21 = arith.constant 1.000000e+00 : f32
    %87 = vector.broadcast %cst_21 : f32 to vector<16x64xf32>
    %88 = arith.addf %87, %86 : vector<16x64xf32>
    %89 = arith.divf %87, %88 : vector<16x64xf32>
    %90 = arith.mulf %84, %89 : vector<16x64xf32>
    %c0_22 = arith.constant 0 : index
    %c0_23 = arith.constant 0 : index
    %c0_24 = arith.constant 0 : index
    %91 = vector.load %arg3[%c0_22, %c0_23, %c0_24] : memref<1x64x64xf32, #tpu.memory_space<vmem>>, vector<1x64x64xf32>
    %92 = vector.shape_cast %91 : vector<1x64x64xf32> to vector<64x64xf32>
    %cst_25 = arith.constant dense<0.000000e+00> : vector<16x64xf32>
    %93 = tpu.matmul %90, %92, %cst_25 {dimension_numbers = #tpu.dot_dimension_numbers<[1], [0], [0], [1], [0, 0, 1, 1], [], []>} : vector<16x64xf32>, vector<64x64xf32>, vector<16x64xf32> -> vector<16x64xf32>
    %94 = vector.broadcast %11 : vector<1x64xf32> to vector<16x64xf32>
    %95 = arith.addf %93, %94 : vector<16x64xf32>
    %cst_26 = arith.constant 0.000000e+00 : f32
    %96 = vector.broadcast %cst_26 : f32 to vector<16x64xf32>
    %97 = arith.maximumf %95, %96 : vector<16x64xf32>
    %98 = math.absf %95 : vector<16x64xf32>
    %cst_27 = arith.constant 0.000000e+00 : f32
    %99 = vector.broadcast %cst_27 : f32 to vector<16x64xf32>
    %100 = arith.subf %99, %98 : vector<16x64xf32>
    %101 = math.exp %100 : vector<16x64xf32>
    %102 = math.log1p %101 : vector<16x64xf32>
    %103 = arith.addf %97, %102 : vector<16x64xf32>
    %104 = arith.mulf %103, %90 : vector<16x64xf32>
    "tpu.trace_start"() <{level = 10 : i32, message = "md,nd->mn"}> : () -> ()
    %cst_28 = arith.constant dense<0.000000e+00> : vector<16x8xf32>
    %105 = tpu.matmul %90, %6, %cst_28 {dimension_numbers = #tpu.dot_dimension_numbers<[1], [1], [0], [0], [0, 0, 1, 0], [], []>} : vector<16x64xf32>, vector<8x64xf32>, vector<16x8xf32> -> vector<16x8xf32>
    "tpu.trace_stop"() : () -> ()
    "tpu.trace_start"() <{level = 10 : i32, message = "nd,md->nm"}> : () -> ()
    %cst_29 = arith.constant dense<0.000000e+00> : vector<8x16xf32>
    %106 = tpu.matmul %7, %90, %cst_29 {dimension_numbers = #tpu.dot_dimension_numbers<[1], [1], [0], [0], [0, 0, 1, 0], [], []>} : vector<8x64xf32>, vector<16x64xf32>, vector<8x16xf32> -> vector<8x16xf32>
    "tpu.trace_stop"() : () -> ()
    %107 = vector.extract_strided_slice %103 {offsets = [0, 0], sizes = [8, 64], strides = [1, 1]} : vector<16x64xf32> to vector<8x64xf32>
    %108 = vector.shape_cast %107 : vector<8x64xf32> to vector<8x1x64xf32>
    %109 = vector.shape_cast %8 : vector<8x64xf32> to vector<1x8x64xf32>
    %110 = vector.broadcast %108 : vector<8x1x64xf32> to vector<8x8x64xf32>
    %111 = vector.broadcast %109 : vector<1x8x64xf32> to vector<8x8x64xf32>
    %112 = arith.mulf %110, %111 : vector<8x8x64xf32>
    %113 = math.exp %112 : vector<8x8x64xf32>
    %114 = vector.extract_strided_slice %105 {offsets = [0, 0], sizes = [8, 8], strides = [1, 1]} : vector<16x8xf32> to vector<8x8xf32>
    %115 = vector.shape_cast %114 : vector<8x8xf32> to vector<8x8x1xf32>
    %116 = vector.extract_strided_slice %104 {offsets = [0, 0], sizes = [8, 64], strides = [1, 1]} : vector<16x64xf32> to vector<8x64xf32>
    %117 = vector.shape_cast %116 : vector<8x64xf32> to vector<8x1x64xf32>
    %118 = vector.broadcast %115 : vector<8x8x1xf32> to vector<8x8x64xf32>
    %119 = vector.broadcast %117 : vector<8x1x64xf32> to vector<8x8x64xf32>
    %120 = arith.mulf %118, %119 : vector<8x8x64xf32>
    %cst_30 = arith.constant 0.000000e+00 : f32
    %121 = vector.broadcast %cst_30 : f32 to vector<8x64xf32>
    %122 = vector.extract_strided_slice %113 {offsets = [0, 0, 0], sizes = [1, 8, 64], strides = [1, 1, 1]} : vector<8x8x64xf32> to vector<1x8x64xf32>
    %123 = vector.shape_cast %122 : vector<1x8x64xf32> to vector<8x64xf32>
    %124 = arith.mulf %123, %121 : vector<8x64xf32>
    %125 = vector.extract_strided_slice %120 {offsets = [0, 0, 0], sizes = [1, 8, 64], strides = [1, 1, 1]} : vector<8x8x64xf32> to vector<1x8x64xf32>
    %126 = vector.shape_cast %125 : vector<1x8x64xf32> to vector<8x64xf32>
    %127 = arith.addf %124, %126 : vector<8x64xf32>
    %128 = vector.extract_strided_slice %106 {offsets = [0, 0], sizes = [8, 1], strides = [1, 1]} : vector<8x16xf32> to vector<8x1xf32>
    %129 = vector.broadcast %128 : vector<8x1xf32> to vector<8x64xf32>
    %130 = arith.mulf %129, %127 : vector<8x64xf32>
    %cst_31 = arith.constant dense<0.000000e+00> : vector<64xf32>
    %131 = vector.multi_reduction <add>, %130, %cst_31 [0] : vector<8x64xf32> to vector<64xf32>
    %132 = vector.shape_cast %131 : vector<64xf32> to vector<1x64xf32>
    %c0_32 = arith.constant 0 : index
    %c0_33 = arith.constant 0 : index
    %133 = vector.load %arg10[%c0_32, %c0_33] : memref<16x64xf32, #tpu.memory_space<vmem>>, vector<1x64xf32>
    tpu.vector_store %arg10[%c0_32, %c0_33], %132 {strides = array<i32>} : memref<16x64xf32, #tpu.memory_space<vmem>>, vector<1x64xf32>,
    %134 = vector.extract_strided_slice %113 {offsets = [1, 0, 0], sizes = [1, 8, 64], strides = [1, 1, 1]} : vector<8x8x64xf32> to vector<1x8x64xf32>
    %135 = vector.shape_cast %134 : vector<1x8x64xf32> to vector<8x64xf32>
    %136 = arith.mulf %135, %127 : vector<8x64xf32>
    %137 = vector.extract_strided_slice %120 {offsets = [1, 0, 0], sizes = [1, 8, 64], strides = [1, 1, 1]} : vector<8x8x64xf32> to vector<1x8x64xf32>
    %138 = vector.shape_cast %137 : vector<1x8x64xf32> to vector<8x64xf32>
    %139 = arith.addf %136, %138 : vector<8x64xf32>
    %140 = vector.extract_strided_slice %106 {offsets = [0, 1], sizes = [8, 1], strides = [1, 1]} : vector<8x16xf32> to vector<8x1xf32>
    %141 = vector.broadcast %140 : vector<8x1xf32> to vector<8x64xf32>
    %142 = arith.mulf %141, %139 : vector<8x64xf32>
    %cst_34 = arith.constant dense<0.000000e+00> : vector<64xf32>
    %143 = vector.multi_reduction <add>, %142, %cst_34 [0] : vector<8x64xf32> to vector<64xf32>
    %144 = vector.shape_cast %143 : vector<64xf32> to vector<1x64xf32>
    %c1 = arith.constant 1 : index
    %c0_35 = arith.constant 0 : index
    %145 = vector.load %arg10[%c1, %c0_35] : memref<16x64xf32, #tpu.memory_space<vmem>>, vector<1x64xf32>
    tpu.vector_store %arg10[%c1, %c0_35], %144 {strides = array<i32>} : memref<16x64xf32, #tpu.memory_space<vmem>>, vector<1x64xf32>,
    %146 = vector.extract_strided_slice %113 {offsets = [2, 0, 0], sizes = [1, 8, 64], strides = [1, 1, 1]} : vector<8x8x64xf32> to vector<1x8x64xf32>
    %147 = vector.shape_cast %146 : vector<1x8x64xf32> to vector<8x64xf32>
    %148 = arith.mulf %147, %139 : vector<8x64xf32>
    %149 = vector.extract_strided_slice %120 {offsets = [2, 0, 0], sizes = [1, 8, 64], strides = [1, 1, 1]} : vector<8x8x64xf32> to vector<1x8x64xf32>
    %150 = vector.shape_cast %149 : vector<1x8x64xf32> to vector<8x64xf32>
    %151 = arith.addf %148, %150 : vector<8x64xf32>
    %152 = vector.extract_strided_slice %106 {offsets = [0, 2], sizes = [8, 1], strides = [1, 1]} : vector<8x16xf32> to vector<8x1xf32>
    %153 = vector.broadcast %152 : vector<8x1xf32> to vector<8x64xf32>
    %154 = arith.mulf %153, %151 : vector<8x64xf32>
    %cst_36 = arith.constant dense<0.000000e+00> : vector<64xf32>
    %155 = vector.multi_reduction <add>, %154, %cst_36 [0] : vector<8x64xf32> to vector<64xf32>
    %156 = vector.shape_cast %155 : vector<64xf32> to vector<1x64xf32>
    %c2 = arith.constant 2 : index
    %c0_37 = arith.constant 0 : index
    %157 = vector.load %arg10[%c2, %c0_37] : memref<16x64xf32, #tpu.memory_space<vmem>>, vector<1x64xf32>
    tpu.vector_store %arg10[%c2, %c0_37], %156 {strides = array<i32>} : memref<16x64xf32, #tpu.memory_space<vmem>>, vector<1x64xf32>,
    %158 = vector.extract_strided_slice %113 {offsets = [3, 0, 0], sizes = [1, 8, 64], strides = [1, 1, 1]} : vector<8x8x64xf32> to vector<1x8x64xf32>
    %159 = vector.shape_cast %158 : vector<1x8x64xf32> to vector<8x64xf32>
    %160 = arith.mulf %159, %151 : vector<8x64xf32>
    %161 = vector.extract_strided_slice %120 {offsets = [3, 0, 0], sizes = [1, 8, 64], strides = [1, 1, 1]} : vector<8x8x64xf32> to vector<1x8x64xf32>
    %162 = vector.shape_cast %161 : vector<1x8x64xf32> to vector<8x64xf32>
    %163 = arith.addf %160, %162 : vector<8x64xf32>
    %164 = vector.extract_strided_slice %106 {offsets = [0, 3], sizes = [8, 1], strides = [1, 1]} : vector<8x16xf32> to vector<8x1xf32>
    %165 = vector.broadcast %164 : vector<8x1xf32> to vector<8x64xf32>
    %166 = arith.mulf %165, %163 : vector<8x64xf32>
    %cst_38 = arith.constant dense<0.000000e+00> : vector<64xf32>
    %167 = vector.multi_reduction <add>, %166, %cst_38 [0] : vector<8x64xf32> to vector<64xf32>
    %168 = vector.shape_cast %167 : vector<64xf32> to vector<1x64xf32>
    %c3 = arith.constant 3 : index
    %c0_39 = arith.constant 0 : index
    %169 = vector.load %arg10[%c3, %c0_39] : memref<16x64xf32, #tpu.memory_space<vmem>>, vector<1x64xf32>
    tpu.vector_store %arg10[%c3, %c0_39], %168 {strides = array<i32>} : memref<16x64xf32, #tpu.memory_space<vmem>>, vector<1x64xf32>,
    %170 = vector.extract_strided_slice %113 {offsets = [4, 0, 0], sizes = [1, 8, 64], strides = [1, 1, 1]} : vector<8x8x64xf32> to vector<1x8x64xf32>
    %171 = vector.shape_cast %170 : vector<1x8x64xf32> to vector<8x64xf32>
    %172 = arith.mulf %171, %163 : vector<8x64xf32>
    %173 = vector.extract_strided_slice %120 {offsets = [4, 0, 0], sizes = [1, 8, 64], strides = [1, 1, 1]} : vector<8x8x64xf32> to vector<1x8x64xf32>
    %174 = vector.shape_cast %173 : vector<1x8x64xf32> to vector<8x64xf32>
    %175 = arith.addf %172, %174 : vector<8x64xf32>
    %176 = vector.extract_strided_slice %106 {offsets = [0, 4], sizes = [8, 1], strides = [1, 1]} : vector<8x16xf32> to vector<8x1xf32>
    %177 = vector.broadcast %176 : vector<8x1xf32> to vector<8x64xf32>
    %178 = arith.mulf %177, %175 : vector<8x64xf32>
    %cst_40 = arith.constant dense<0.000000e+00> : vector<64xf32>
    %179 = vector.multi_reduction <add>, %178, %cst_40 [0] : vector<8x64xf32> to vector<64xf32>
    %180 = vector.shape_cast %179 : vector<64xf32> to vector<1x64xf32>
    %c4 = arith.constant 4 : index
    %c0_41 = arith.constant 0 : index
    %181 = vector.load %arg10[%c4, %c0_41] : memref<16x64xf32, #tpu.memory_space<vmem>>, vector<1x64xf32>
    tpu.vector_store %arg10[%c4, %c0_41], %180 {strides = array<i32>} : memref<16x64xf32, #tpu.memory_space<vmem>>, vector<1x64xf32>,
    %182 = vector.extract_strided_slice %113 {offsets = [5, 0, 0], sizes = [1, 8, 64], strides = [1, 1, 1]} : vector<8x8x64xf32> to vector<1x8x64xf32>
    %183 = vector.shape_cast %182 : vector<1x8x64xf32> to vector<8x64xf32>
    %184 = arith.mulf %183, %175 : vector<8x64xf32>
    %185 = vector.extract_strided_slice %120 {offsets = [5, 0, 0], sizes = [1, 8, 64], strides = [1, 1, 1]} : vector<8x8x64xf32> to vector<1x8x64xf32>
    %186 = vector.shape_cast %185 : vector<1x8x64xf32> to vector<8x64xf32>
    %187 = arith.addf %184, %186 : vector<8x64xf32>
    %188 = vector.extract_strided_slice %106 {offsets = [0, 5], sizes = [8, 1], strides = [1, 1]} : vector<8x16xf32> to vector<8x1xf32>
    %189 = vector.broadcast %188 : vector<8x1xf32> to vector<8x64xf32>
    %190 = arith.mulf %189, %187 : vector<8x64xf32>
    %cst_42 = arith.constant dense<0.000000e+00> : vector<64xf32>
    %191 = vector.multi_reduction <add>, %190, %cst_42 [0] : vector<8x64xf32> to vector<64xf32>
    %192 = vector.shape_cast %191 : vector<64xf32> to vector<1x64xf32>
    %c5 = arith.constant 5 : index
    %c0_43 = arith.constant 0 : index
    %193 = vector.load %arg10[%c5, %c0_43] : memref<16x64xf32, #tpu.memory_space<vmem>>, vector<1x64xf32>
    tpu.vector_store %arg10[%c5, %c0_43], %192 {strides = array<i32>} : memref<16x64xf32, #tpu.memory_space<vmem>>, vector<1x64xf32>,
    %194 = vector.extract_strided_slice %113 {offsets = [6, 0, 0], sizes = [1, 8, 64], strides = [1, 1, 1]} : vector<8x8x64xf32> to vector<1x8x64xf32>
    %195 = vector.shape_cast %194 : vector<1x8x64xf32> to vector<8x64xf32>
    %196 = arith.mulf %195, %187 : vector<8x64xf32>
    %197 = vector.extract_strided_slice %120 {offsets = [6, 0, 0], sizes = [1, 8, 64], strides = [1, 1, 1]} : vector<8x8x64xf32> to vector<1x8x64xf32>
    %198 = vector.shape_cast %197 : vector<1x8x64xf32> to vector<8x64xf32>
    %199 = arith.addf %196, %198 : vector<8x64xf32>
    %200 = vector.extract_strided_slice %106 {offsets = [0, 6], sizes = [8, 1], strides = [1, 1]} : vector<8x16xf32> to vector<8x1xf32>
    %201 = vector.broadcast %200 : vector<8x1xf32> to vector<8x64xf32>
    %202 = arith.mulf %201, %199 : vector<8x64xf32>
    %cst_44 = arith.constant dense<0.000000e+00> : vector<64xf32>
    %203 = vector.multi_reduction <add>, %202, %cst_44 [0] : vector<8x64xf32> to vector<64xf32>
    %204 = vector.shape_cast %203 : vector<64xf32> to vector<1x64xf32>
    %c6 = arith.constant 6 : index
    %c0_45 = arith.constant 0 : index
    %205 = vector.load %arg10[%c6, %c0_45] : memref<16x64xf32, #tpu.memory_space<vmem>>, vector<1x64xf32>
    tpu.vector_store %arg10[%c6, %c0_45], %204 {strides = array<i32>} : memref<16x64xf32, #tpu.memory_space<vmem>>, vector<1x64xf32>,
    %206 = vector.extract_strided_slice %113 {offsets = [7, 0, 0], sizes = [1, 8, 64], strides = [1, 1, 1]} : vector<8x8x64xf32> to vector<1x8x64xf32>
    %207 = vector.shape_cast %206 : vector<1x8x64xf32> to vector<8x64xf32>
    %208 = arith.mulf %207, %199 : vector<8x64xf32>
    %209 = vector.extract_strided_slice %120 {offsets = [7, 0, 0], sizes = [1, 8, 64], strides = [1, 1, 1]} : vector<8x8x64xf32> to vector<1x8x64xf32>
    %210 = vector.shape_cast %209 : vector<1x8x64xf32> to vector<8x64xf32>
    %211 = arith.addf %208, %210 : vector<8x64xf32>
    %212 = vector.extract_strided_slice %106 {offsets = [0, 7], sizes = [8, 1], strides = [1, 1]} : vector<8x16xf32> to vector<8x1xf32>
    %213 = vector.broadcast %212 : vector<8x1xf32> to vector<8x64xf32>
    %214 = arith.mulf %213, %211 : vector<8x64xf32>
    %cst_46 = arith.constant dense<0.000000e+00> : vector<64xf32>
    %215 = vector.multi_reduction <add>, %214, %cst_46 [0] : vector<8x64xf32> to vector<64xf32>
    %216 = vector.shape_cast %215 : vector<64xf32> to vector<1x64xf32>
    %c7 = arith.constant 7 : index
    %c0_47 = arith.constant 0 : index
    %217 = vector.load %arg10[%c7, %c0_47] : memref<16x64xf32, #tpu.memory_space<vmem>>, vector<1x64xf32>
    tpu.vector_store %arg10[%c7, %c0_47], %216 {strides = array<i32>} : memref<16x64xf32, #tpu.memory_space<vmem>>, vector<1x64xf32>,
    %218 = vector.extract_strided_slice %103 {offsets = [8, 0], sizes = [8, 64], strides = [1, 1]} : vector<16x64xf32> to vector<8x64xf32>
    %219 = vector.shape_cast %218 : vector<8x64xf32> to vector<8x1x64xf32>
    %220 = vector.shape_cast %8 : vector<8x64xf32> to vector<1x8x64xf32>
    %221 = vector.broadcast %219 : vector<8x1x64xf32> to vector<8x8x64xf32>
    %222 = vector.broadcast %220 : vector<1x8x64xf32> to vector<8x8x64xf32>
    %223 = arith.mulf %221, %222 : vector<8x8x64xf32>
    %224 = math.exp %223 : vector<8x8x64xf32>
    %225 = vector.extract_strided_slice %105 {offsets = [8, 0], sizes = [8, 8], strides = [1, 1]} : vector<16x8xf32> to vector<8x8xf32>
    %226 = vector.shape_cast %225 : vector<8x8xf32> to vector<8x8x1xf32>
    %227 = vector.extract_strided_slice %104 {offsets = [8, 0], sizes = [8, 64], strides = [1, 1]} : vector<16x64xf32> to vector<8x64xf32>
    %228 = vector.shape_cast %227 : vector<8x64xf32> to vector<8x1x64xf32>
    %229 = vector.broadcast %226 : vector<8x8x1xf32> to vector<8x8x64xf32>
    %230 = vector.broadcast %228 : vector<8x1x64xf32> to vector<8x8x64xf32>
    %231 = arith.mulf %229, %230 : vector<8x8x64xf32>
    %cst_48 = arith.constant 0.000000e+00 : f32
    %232 = vector.broadcast %cst_48 : f32 to vector<8x64xf32>
    %233 = vector.extract_strided_slice %224 {offsets = [0, 0, 0], sizes = [1, 8, 64], strides = [1, 1, 1]} : vector<8x8x64xf32> to vector<1x8x64xf32>
    %234 = vector.shape_cast %233 : vector<1x8x64xf32> to vector<8x64xf32>
    %235 = arith.mulf %234, %232 : vector<8x64xf32>
    %236 = vector.extract_strided_slice %231 {offsets = [0, 0, 0], sizes = [1, 8, 64], strides = [1, 1, 1]} : vector<8x8x64xf32> to vector<1x8x64xf32>
    %237 = vector.shape_cast %236 : vector<1x8x64xf32> to vector<8x64xf32>
    %238 = arith.addf %235, %237 : vector<8x64xf32>
    %239 = vector.extract_strided_slice %106 {offsets = [0, 8], sizes = [8, 1], strides = [1, 1]} : vector<8x16xf32> to vector<8x1xf32>
    %240 = vector.broadcast %239 : vector<8x1xf32> to vector<8x64xf32>
    %241 = arith.mulf %240, %238 : vector<8x64xf32>
    %cst_49 = arith.constant dense<0.000000e+00> : vector<64xf32>
    %242 = vector.multi_reduction <add>, %241, %cst_49 [0] : vector<8x64xf32> to vector<64xf32>
    %243 = vector.shape_cast %242 : vector<64xf32> to vector<1x64xf32>
    %c8 = arith.constant 8 : index
    %c0_50 = arith.constant 0 : index
    %244 = vector.load %arg10[%c8, %c0_50] : memref<16x64xf32, #tpu.memory_space<vmem>>, vector<1x64xf32>
    tpu.vector_store %arg10[%c8, %c0_50], %243 {strides = array<i32>} : memref<16x64xf32, #tpu.memory_space<vmem>>, vector<1x64xf32>,
    %245 = vector.extract_strided_slice %224 {offsets = [1, 0, 0], sizes = [1, 8, 64], strides = [1, 1, 1]} : vector<8x8x64xf32> to vector<1x8x64xf32>
    %246 = vector.shape_cast %245 : vector<1x8x64xf32> to vector<8x64xf32>
    %247 = arith.mulf %246, %238 : vector<8x64xf32>
    %248 = vector.extract_strided_slice %231 {offsets = [1, 0, 0], sizes = [1, 8, 64], strides = [1, 1, 1]} : vector<8x8x64xf32> to vector<1x8x64xf32>
    %249 = vector.shape_cast %248 : vector<1x8x64xf32> to vector<8x64xf32>
    %250 = arith.addf %247, %249 : vector<8x64xf32>
    %251 = vector.extract_strided_slice %106 {offsets = [0, 9], sizes = [8, 1], strides = [1, 1]} : vector<8x16xf32> to vector<8x1xf32>
    %252 = vector.broadcast %251 : vector<8x1xf32> to vector<8x64xf32>
    %253 = arith.mulf %252, %250 : vector<8x64xf32>
    %cst_51 = arith.constant dense<0.000000e+00> : vector<64xf32>
    %254 = vector.multi_reduction <add>, %253, %cst_51 [0] : vector<8x64xf32> to vector<64xf32>
    %255 = vector.shape_cast %254 : vector<64xf32> to vector<1x64xf32>
    %c9 = arith.constant 9 : index
    %c0_52 = arith.constant 0 : index
    %256 = vector.load %arg10[%c9, %c0_52] : memref<16x64xf32, #tpu.memory_space<vmem>>, vector<1x64xf32>
    tpu.vector_store %arg10[%c9, %c0_52], %255 {strides = array<i32>} : memref<16x64xf32, #tpu.memory_space<vmem>>, vector<1x64xf32>,
    %257 = vector.extract_strided_slice %224 {offsets = [2, 0, 0], sizes = [1, 8, 64], strides = [1, 1, 1]} : vector<8x8x64xf32> to vector<1x8x64xf32>
    %258 = vector.shape_cast %257 : vector<1x8x64xf32> to vector<8x64xf32>
    %259 = arith.mulf %258, %250 : vector<8x64xf32>
    %260 = vector.extract_strided_slice %231 {offsets = [2, 0, 0], sizes = [1, 8, 64], strides = [1, 1, 1]} : vector<8x8x64xf32> to vector<1x8x64xf32>
    %261 = vector.shape_cast %260 : vector<1x8x64xf32> to vector<8x64xf32>
    %262 = arith.addf %259, %261 : vector<8x64xf32>
    %263 = vector.extract_strided_slice %106 {offsets = [0, 10], sizes = [8, 1], strides = [1, 1]} : vector<8x16xf32> to vector<8x1xf32>
    %264 = vector.broadcast %263 : vector<8x1xf32> to vector<8x64xf32>
    %265 = arith.mulf %264, %262 : vector<8x64xf32>
    %cst_53 = arith.constant dense<0.000000e+00> : vector<64xf32>
    %266 = vector.multi_reduction <add>, %265, %cst_53 [0] : vector<8x64xf32> to vector<64xf32>
    %267 = vector.shape_cast %266 : vector<64xf32> to vector<1x64xf32>
    %c10 = arith.constant 10 : index
    %c0_54 = arith.constant 0 : index
    %268 = vector.load %arg10[%c10, %c0_54] : memref<16x64xf32, #tpu.memory_space<vmem>>, vector<1x64xf32>
    tpu.vector_store %arg10[%c10, %c0_54], %267 {strides = array<i32>} : memref<16x64xf32, #tpu.memory_space<vmem>>, vector<1x64xf32>,
    %269 = vector.extract_strided_slice %224 {offsets = [3, 0, 0], sizes = [1, 8, 64], strides = [1, 1, 1]} : vector<8x8x64xf32> to vector<1x8x64xf32>
    %270 = vector.shape_cast %269 : vector<1x8x64xf32> to vector<8x64xf32>
    %271 = arith.mulf %270, %262 : vector<8x64xf32>
    %272 = vector.extract_strided_slice %231 {offsets = [3, 0, 0], sizes = [1, 8, 64], strides = [1, 1, 1]} : vector<8x8x64xf32> to vector<1x8x64xf32>
    %273 = vector.shape_cast %272 : vector<1x8x64xf32> to vector<8x64xf32>
    %274 = arith.addf %271, %273 : vector<8x64xf32>
    %275 = vector.extract_strided_slice %106 {offsets = [0, 11], sizes = [8, 1], strides = [1, 1]} : vector<8x16xf32> to vector<8x1xf32>
    %276 = vector.broadcast %275 : vector<8x1xf32> to vector<8x64xf32>
    %277 = arith.mulf %276, %274 : vector<8x64xf32>
    %cst_55 = arith.constant dense<0.000000e+00> : vector<64xf32>
    %278 = vector.multi_reduction <add>, %277, %cst_55 [0] : vector<8x64xf32> to vector<64xf32>
    %279 = vector.shape_cast %278 : vector<64xf32> to vector<1x64xf32>
    %c11 = arith.constant 11 : index
    %c0_56 = arith.constant 0 : index
    %280 = vector.load %arg10[%c11, %c0_56] : memref<16x64xf32, #tpu.memory_space<vmem>>, vector<1x64xf32>
    tpu.vector_store %arg10[%c11, %c0_56], %279 {strides = array<i32>} : memref<16x64xf32, #tpu.memory_space<vmem>>, vector<1x64xf32>,
    %281 = vector.extract_strided_slice %224 {offsets = [4, 0, 0], sizes = [1, 8, 64], strides = [1, 1, 1]} : vector<8x8x64xf32> to vector<1x8x64xf32>
    %282 = vector.shape_cast %281 : vector<1x8x64xf32> to vector<8x64xf32>
    %283 = arith.mulf %282, %274 : vector<8x64xf32>
    %284 = vector.extract_strided_slice %231 {offsets = [4, 0, 0], sizes = [1, 8, 64], strides = [1, 1, 1]} : vector<8x8x64xf32> to vector<1x8x64xf32>
    %285 = vector.shape_cast %284 : vector<1x8x64xf32> to vector<8x64xf32>
    %286 = arith.addf %283, %285 : vector<8x64xf32>
    %287 = vector.extract_strided_slice %106 {offsets = [0, 12], sizes = [8, 1], strides = [1, 1]} : vector<8x16xf32> to vector<8x1xf32>
    %288 = vector.broadcast %287 : vector<8x1xf32> to vector<8x64xf32>
    %289 = arith.mulf %288, %286 : vector<8x64xf32>
    %cst_57 = arith.constant dense<0.000000e+00> : vector<64xf32>
    %290 = vector.multi_reduction <add>, %289, %cst_57 [0] : vector<8x64xf32> to vector<64xf32>
    %291 = vector.shape_cast %290 : vector<64xf32> to vector<1x64xf32>
    %c12 = arith.constant 12 : index
    %c0_58 = arith.constant 0 : index
    %292 = vector.load %arg10[%c12, %c0_58] : memref<16x64xf32, #tpu.memory_space<vmem>>, vector<1x64xf32>
    tpu.vector_store %arg10[%c12, %c0_58], %291 {strides = array<i32>} : memref<16x64xf32, #tpu.memory_space<vmem>>, vector<1x64xf32>,
    %293 = vector.extract_strided_slice %224 {offsets = [5, 0, 0], sizes = [1, 8, 64], strides = [1, 1, 1]} : vector<8x8x64xf32> to vector<1x8x64xf32>
    %294 = vector.shape_cast %293 : vector<1x8x64xf32> to vector<8x64xf32>
    %295 = arith.mulf %294, %286 : vector<8x64xf32>
    %296 = vector.extract_strided_slice %231 {offsets = [5, 0, 0], sizes = [1, 8, 64], strides = [1, 1, 1]} : vector<8x8x64xf32> to vector<1x8x64xf32>
    %297 = vector.shape_cast %296 : vector<1x8x64xf32> to vector<8x64xf32>
    %298 = arith.addf %295, %297 : vector<8x64xf32>
    %299 = vector.extract_strided_slice %106 {offsets = [0, 13], sizes = [8, 1], strides = [1, 1]} : vector<8x16xf32> to vector<8x1xf32>
    %300 = vector.broadcast %299 : vector<8x1xf32> to vector<8x64xf32>
    %301 = arith.mulf %300, %298 : vector<8x64xf32>
    %cst_59 = arith.constant dense<0.000000e+00> : vector<64xf32>
    %302 = vector.multi_reduction <add>, %301, %cst_59 [0] : vector<8x64xf32> to vector<64xf32>
    %303 = vector.shape_cast %302 : vector<64xf32> to vector<1x64xf32>
    %c13 = arith.constant 13 : index
    %c0_60 = arith.constant 0 : index
    %304 = vector.load %arg10[%c13, %c0_60] : memref<16x64xf32, #tpu.memory_space<vmem>>, vector<1x64xf32>
    tpu.vector_store %arg10[%c13, %c0_60], %303 {strides = array<i32>} : memref<16x64xf32, #tpu.memory_space<vmem>>, vector<1x64xf32>,
    %305 = vector.extract_strided_slice %224 {offsets = [6, 0, 0], sizes = [1, 8, 64], strides = [1, 1, 1]} : vector<8x8x64xf32> to vector<1x8x64xf32>
    %306 = vector.shape_cast %305 : vector<1x8x64xf32> to vector<8x64xf32>
    %307 = arith.mulf %306, %298 : vector<8x64xf32>
    %308 = vector.extract_strided_slice %231 {offsets = [6, 0, 0], sizes = [1, 8, 64], strides = [1, 1, 1]} : vector<8x8x64xf32> to vector<1x8x64xf32>
    %309 = vector.shape_cast %308 : vector<1x8x64xf32> to vector<8x64xf32>
    %310 = arith.addf %307, %309 : vector<8x64xf32>
    %311 = vector.extract_strided_slice %106 {offsets = [0, 14], sizes = [8, 1], strides = [1, 1]} : vector<8x16xf32> to vector<8x1xf32>
    %312 = vector.broadcast %311 : vector<8x1xf32> to vector<8x64xf32>
    %313 = arith.mulf %312, %310 : vector<8x64xf32>
    %cst_61 = arith.constant dense<0.000000e+00> : vector<64xf32>
    %314 = vector.multi_reduction <add>, %313, %cst_61 [0] : vector<8x64xf32> to vector<64xf32>
    %315 = vector.shape_cast %314 : vector<64xf32> to vector<1x64xf32>
    %c14 = arith.constant 14 : index
    %c0_62 = arith.constant 0 : index
    %316 = vector.load %arg10[%c14, %c0_62] : memref<16x64xf32, #tpu.memory_space<vmem>>, vector<1x64xf32>
    tpu.vector_store %arg10[%c14, %c0_62], %315 {strides = array<i32>} : memref<16x64xf32, #tpu.memory_space<vmem>>, vector<1x64xf32>,
    %317 = vector.extract_strided_slice %224 {offsets = [7, 0, 0], sizes = [1, 8, 64], strides = [1, 1, 1]} : vector<8x8x64xf32> to vector<1x8x64xf32>
    %318 = vector.shape_cast %317 : vector<1x8x64xf32> to vector<8x64xf32>
    %319 = arith.mulf %318, %310 : vector<8x64xf32>
    %320 = vector.extract_strided_slice %231 {offsets = [7, 0, 0], sizes = [1, 8, 64], strides = [1, 1, 1]} : vector<8x8x64xf32> to vector<1x8x64xf32>
    %321 = vector.shape_cast %320 : vector<1x8x64xf32> to vector<8x64xf32>
    %322 = arith.addf %319, %321 : vector<8x64xf32>
    %323 = vector.extract_strided_slice %106 {offsets = [0, 15], sizes = [8, 1], strides = [1, 1]} : vector<8x16xf32> to vector<8x1xf32>
    %324 = vector.broadcast %323 : vector<8x1xf32> to vector<8x64xf32>
    %325 = arith.mulf %324, %322 : vector<8x64xf32>
    %cst_63 = arith.constant dense<0.000000e+00> : vector<64xf32>
    %326 = vector.multi_reduction <add>, %325, %cst_63 [0] : vector<8x64xf32> to vector<64xf32>
    %327 = vector.shape_cast %326 : vector<64xf32> to vector<1x64xf32>
    %c15 = arith.constant 15 : index
    %c0_64 = arith.constant 0 : index
    %328 = vector.load %arg10[%c15, %c0_64] : memref<16x64xf32, #tpu.memory_space<vmem>>, vector<1x64xf32>
    tpu.vector_store %arg10[%c15, %c0_64], %327 {strides = array<i32>} : memref<16x64xf32, #tpu.memory_space<vmem>>, vector<1x64xf32>,
    %c0_65 = arith.constant 0 : index
    %c0_66 = arith.constant 0 : index
    %329 = vector.load %arg10[%c0_65, %c0_66] : memref<16x64xf32, #tpu.memory_space<vmem>>, vector<16x64xf32>
    %330 = vector.broadcast %12 : vector<1x64xf32> to vector<16x64xf32>
    %331 = arith.mulf %330, %90 : vector<16x64xf32>
    %332 = arith.addf %329, %331 : vector<16x64xf32>
    %333 = arith.negf %30 : vector<16x64xf32>
    %334 = math.exp %333 : vector<16x64xf32>
    %cst_67 = arith.constant 1.000000e+00 : f32
    %335 = vector.broadcast %cst_67 : f32 to vector<16x64xf32>
    %336 = arith.addf %335, %334 : vector<16x64xf32>
    %337 = arith.divf %335, %336 : vector<16x64xf32>
    %338 = arith.mulf %30, %337 : vector<16x64xf32>
    %339 = arith.mulf %332, %338 : vector<16x64xf32>
    %c0_68 = arith.constant 0 : index
    %c0_69 = arith.constant 0 : index
    %c0_70 = arith.constant 0 : index
    %340 = vector.load %arg4[%c0_68, %c0_69, %c0_70] : memref<1x64x32xf32, #tpu.memory_space<vmem>>, vector<1x64x32xf32>
    %341 = vector.shape_cast %340 : vector<1x64x32xf32> to vector<64x32xf32>
    %cst_71 = arith.constant dense<0.000000e+00> : vector<16x32xf32>
    %342 = tpu.matmul %339, %341, %cst_71 {dimension_numbers = #tpu.dot_dimension_numbers<[1], [0], [0], [1], [0, 0, 1, 1], [], []>} : vector<16x64xf32>, vector<64x32xf32>, vector<16x32xf32> -> vector<16x32xf32>
    %343 = arith.addf %3, %342 : vector<16x32xf32>
    %c0_72 = arith.constant 0 : index
    %c0_73 = arith.constant 0 : index
    %344 = vector.load %arg9[%c0_72, %c0_73] : memref<16x32xf32, #tpu.memory_space<vmem>>, vector<16x32xf32>
    tpu.vector_store %arg9[%c0_72, %c0_73], %343 {strides = array<i32>} : memref<16x32xf32, #tpu.memory_space<vmem>>, vector<16x32xf32>,
    %c1_i32_74 = arith.constant 1 : i32
    %345 = arith.cmpi eq, %arg0, %c1_i32_74 : i32
    %346 = arith.extui %345 : i1 to i32
    %c0_i32_75 = arith.constant 0 : i32
    %347 = arith.cmpi ne, %346, %c0_i32_75 : i32
    scf.if %347 {
      %348 = arith.mulf %343, %343 : vector<16x32xf32>
      %cst_76 = arith.constant dense<0.000000e+00> : vector<16xf32>
      %349 = vector.multi_reduction <add>, %348, %cst_76 [1] : vector<16x32xf32> to vector<16xf32>
      %350 = vector.shape_cast %349 : vector<16xf32> to vector<16x1xf32>
      %cst_77 = arith.constant 3.200000e+01 : f32
      %351 = vector.broadcast %cst_77 : f32 to vector<16x1xf32>
      %352 = arith.divf %350, %351 : vector<16x1xf32>
      %cst_78 = arith.constant 9.99999974E-6 : f32
      %353 = vector.broadcast %cst_78 : f32 to vector<16x1xf32>
      %354 = arith.addf %352, %353 : vector<16x1xf32>
      %355 = math.rsqrt %354 : vector<16x1xf32>
      %356 = vector.broadcast %355 : vector<16x1xf32> to vector<16x32xf32>
      %357 = arith.mulf %343, %356 : vector<16x32xf32>
      %c0_79 = arith.constant 0 : index
      %c0_80 = arith.constant 0 : index
      %358 = vector.load %arg6[%c0_79, %c0_80] : memref<1x32xf32, #tpu.memory_space<vmem>>, vector<1x32xf32>
      %359 = vector.broadcast %358 : vector<1x32xf32> to vector<16x32xf32>
      %360 = arith.mulf %357, %359 : vector<16x32xf32>
      %c0_81 = arith.constant 0 : index
      %c0_82 = arith.constant 0 : index
      %361 = vector.load %arg7[%c0_81, %c0_82] : memref<32x128xf32, #tpu.memory_space<vmem>>, vector<32x128xf32>
      %cst_83 = arith.constant dense<0.000000e+00> : vector<16x128xf32>
      %362 = tpu.matmul %360, %361, %cst_83 {dimension_numbers = #tpu.dot_dimension_numbers<[1], [0], [0], [1], [0, 0, 1, 1], [], []>} : vector<16x32xf32>, vector<32x128xf32>, vector<16x128xf32> -> vector<16x128xf32>
      %c0_84 = arith.constant 0 : index
      %c0_85 = arith.constant 0 : index
      %363 = vector.load %arg8[%c0_84, %c0_85] : memref<16x128xf32, #tpu.memory_space<vmem>>, vector<16x128xf32>
      tpu.vector_store %arg8[%c0_84, %c0_85], %362 {strides = array<i32>} : memref<16x128xf32, #tpu.memory_space<vmem>>, vector<16x128xf32>,
    } else {
    }
    return
  }
  func.func @transform_0(%arg0: i32) -> (i32, i32) {
    %c0_i32 = arith.constant 0 : i32
    %c0_i32_0 = arith.constant 0 : i32
    %c0_i32_1 = arith.constant 0 : i32
    return %c0_i32, %c0_i32_0 : i32, i32
  }
  func.func @transform_1(%arg0: i32) -> (i32, i32, i32) {
    %c0_i32 = arith.constant 0 : i32
    %c0_i32_0 = arith.constant 0 : i32
    %c0_i32_1 = arith.constant 0 : i32
    return %arg0, %c0_i32, %c0_i32_0 : i32, i32, i32
  }
  func.func @transform_2(%arg0: i32) -> (i32, i32, i32) {
    %c0_i32 = arith.constant 0 : i32
    %c0_i32_0 = arith.constant 0 : i32
    %c0_i32_1 = arith.constant 0 : i32
    return %arg0, %c0_i32, %c0_i32_0 : i32, i32, i32
  }
  func.func @transform_3(%arg0: i32) -> (i32, i32, i32) {
    %c0_i32 = arith.constant 0 : i32
    %c0_i32_0 = arith.constant 0 : i32
    %c0_i32_1 = arith.constant 0 : i32
    return %arg0, %c0_i32, %c0_i32_0 : i32, i32, i32
  }
  func.func @transform_4(%arg0: i32) -> (i32, i32, i32) {
    %c0_i32 = arith.constant 0 : i32
    %c0_i32_0 = arith.constant 0 : i32
    %c0_i32_1 = arith.constant 0 : i32
    return %arg0, %c0_i32, %c0_i32_0 : i32, i32, i32
  }
  func.func @transform_5(%arg0: i32) -> (i32, i32) {
    %c0_i32 = arith.constant 0 : i32
    %c0_i32_0 = arith.constant 0 : i32
    %c0_i32_1 = arith.constant 0 : i32
    return %c0_i32, %c0_i32_0 : i32, i32
  }
  func.func @transform_6(%arg0: i32) -> (i32, i32) {
    %c0_i32 = arith.constant 0 : i32
    %c0_i32_0 = arith.constant 0 : i32
    %c0_i32_1 = arith.constant 0 : i32
    return %c0_i32, %c0_i32_0 : i32, i32
  }
  func.func @transform_7(%arg0: i32) -> (i32, i32) {
    %c0_i32 = arith.constant 0 : i32
    %c0_i32_0 = arith.constant 0 : i32
    %c0_i32_1 = arith.constant 0 : i32
    return %c0_i32, %c0_i32_0 : i32, i32
  }
}

</mosaic_0001>

<bundles_post_ra>
// kernel: mamba_model_forward.1
= control target key start
LH: loop header
LB: loop body
LE: loop exit
PB: predicated region body
PF: predicated region fallthrough
CT: control target
= control target key end

     0   :  { %s2322_s24 = smov 0   ;;  %s2788_s0 = inlined_call_operand.vmem [shape: f32[16,32], index: 0, kind: input, shape index: {}]   ;;  %s2789_s1 = inlined_call_operand.vmem [shape: f32[2,32,128], index: 1, kind: input, shape index: {}]   ;;  %s2790_s2 = inlined_call_operand.vmem [shape: f32[2,64,64], index: 2, kind: input, shape index: {}]   ;;  %s2791_s3 = inlined_call_operand.vmem [shape: f32[2,64,32], index: 3, kind: input, shape index: {}]   ;;  %s2792_s4 = inlined_call_operand.vmem [shape: f32[2,32,64], index: 4, kind: input, shape index: {}]   ;;  %s2793_s5 = inlined_call_operand.vmem [shape: f32[1,32], index: 5, kind: input, shape index: {}]   ;;  %s2794_s6 = inlined_call_operand.vmem [shape: f32[32,128], index: 6, kind: input, shape index: {}]   ;;  %s2795_s7 = inlined_call_operand.vmem [shape: f32[16,128], index: 7, kind: output, shape index: {}]  }
   0x1 LB: > { %s2328_s25 = sadd.s32 4294967295, %s2259_s24   ;;  %p1942_p0 = scmp.ge.s32.totalorder %s2259_s24, 1  ;;  %s2259_s24 = sphi %s2322_s24, %s17_s24  }
   0x2   : > { %p262_p1 = scmp.lt.s32.totalorder %s2259_s24, 3 }
   0x4   : > { %p263_p2 = pnand %p1942_p0, %p262_p1 }
   0x5   : > { %p304_p3 = scmp.lt.s32.totalorder (!%p263_p2), %s2328_s25, 1  ;;  %p1951_p4 = scmp.ne.s32.totalorder (!%p263_p2), %s2328_s25, 0 }
   0x6   : > { %266 = sbr.rel (%p263_p2) target bundleno = 1512 (0x5e8), region = 48 }
   0xd   : > { %s305_s26 = scalar_select %p304_p3, %s2328_s25, 1 }
   0xe   : > { %327 = sbr.rel (%p1951_p4) target bundleno = 21 (0x15), region = 52  ;;  %v328_v0 = vld [vmem:[%s2788_s0] sm:$0xff] (!%p1951_p4)  ;;  %vm330_vm0 = vcmask (!%p1951_p4), 261120   ;;  %v329_v1 = vld [vmem:[%s2788_s0 + $0x8] sm:$0xff] (!%p1951_p4) }
   0xf   : > { %s1974_s27 = sshll.u32 %s305_s26, 5  ;;  %s1975_s28 = sshll.u32 %s305_s26, 6  ;;  %331 = vst.msk [vmem:[#allocation2] sm:$0xff] (!%p1951_p4), %vm330_vm0, %v328_v0  ;;  %332 = vst.msk [vmem:[#allocation2 + $0x8] sm:$0xff] (!%p1951_p4), %vm330_vm0, %v329_v1 }
  0x10   : > { %s308_s8 = scalar_lea.vmem %s2789_s1, %s1974_s27  ;;  %s2340_s11 = scalar_lea.vmem %s2790_s2, %s1975_s28 }
  0x11   : > { %s2345_s14 = scalar_lea.vmem %s2791_s3, %s1975_s28  ;;  %s2350_s17 = scalar_lea.vmem %s2792_s4, %s1974_s27 }
  0x15 PF: > { %vm341_vm1 = vcmask 261120   ;;  %v363_v8 = vld [vmem:[%s308_s8] sm:$0xff]  ;;  %v364_v9 = vld [vmem:[%s308_s8 + $0x8] sm:$0xff]  ;;  %v365_v10 = vld [vmem:[%s308_s8 + $0x10] sm:$0xff]  ;;  %v357_v16 = vlaneseq  ;;  %vm589_vm2 = vcmask 523264   ;;  %v2261_v44 = vmov 0.0|0.0  }
  0x16   : > { %v333_v2 = vld [vmem:[#allocation2] sm:$0xff]  ;;  %v334_v3 = vld [vmem:[#allocation2 + $0x8] sm:$0xff]  ;;  %v2088_v11 = vpack.c.bf16 %v364_v9, %v363_v8  ;;  %v366_v12 = vld [vmem:[%s308_s8 + $0x18] sm:$0xff]  ;;  %vm477_vm3 = vcmask 1042432   ;;  %vm505_vm6 = vcmask 1046528   ;;  %vm525_vm9 = vcmask 1045504  }
  0x17   : > { %v339_v4 = vmul.f32 %v333_v2, %v333_v2  ;;  %v340_v5 = vmul.f32 %v334_v3, %v334_v3  ;;  %v2092_v13 = vpack.c.bf16 %v366_v12, %v365_v10  ;;  %v2361_v20 = vshrl.u32 %v357_v16, 7  ;;  %v2367_v23 = vld [vmem:[%s2350_s17 + $0x18] sm:$0xff]  ;;  %v577_v31 = vld [vmem:[%s2340_s11] sm:$0xff]  ;;  %v578_v32 = vld [vmem:[%s2340_s11 + $0x8] sm:$0xff]  ;;  %s2273_s22 = smov 64   ;;  %p1968_p5 = scmp.ne.s32.totalorder %s2328_s25, 1 }
  0x18   : > { %2089 = vmatprep.subr.bf16.mxu0 %v2088_v11  ;;  %v579_v33 = vld [vmem:[%s2340_s11 + $0x10] sm:$0xff]  ;;  %v2096_v34 = vpack.c.bf16 %v578_v32, %v577_v31  ;;  %v580_v35 = vld [vmem:[%s2340_s11 + $0x18] sm:$0xff]  ;;  %v581_v37 = vld [vmem:[%s2340_s11 + $0x20] sm:$0xff]  ;;  %vm553_vm12 = vcmask 1044480   ;;  %vm2262_vm14 = vmmov 0  }
  0x19   : > { %v342_v6 = vsel %vm341_vm1, %v339_v4, 0.0  ;;  %v345_v7 = vsel %vm341_vm1, %v340_v5, 0.0  ;;  %2091 = vmatpush3.bf16.msra.mxu0 %v2088_v11  ;;  %v2364_v22 = vsub.s32 7, %v2361_v20  ;;  %v2100_v36 = vpack.c.bf16 %v580_v35, %v579_v33  ;;  %v582_v38 = vld [vmem:[%s2340_s11 + $0x28] sm:$0xff]  ;;  %v335_v39 = vld [vmem:[%s2350_s17] sm:$0xff]  ;;  %v583_v41 = vld [vmem:[%s2340_s11 + $0x30] sm:$0xff] }
  0x1a   : > { %343 = vadd.xlane.f32.xlu0 %v342_v6  ;;  %2093 = vmatprep.subr.bf16.mxu0 %v2092_v13  ;;  %v2104_v40 = vpack.c.bf16 %v582_v38, %v581_v37  ;;  %v584_v42 = vld [vmem:[%s2340_s11 + $0x38] sm:$0xff]  ;;  %v450_v45 = vadd.s32 8, %v2361_v20  ;;  %v2386_v46 = vsub.s32 3, %v2361_v20  ;;  %v455_v47 = vand.u32 7, %v2361_v20  ;;  %vm2114_vm13 = vmpackc.low %vm589_vm2, %vm589_vm2 }
  0x1b   : > { %v360_v24 = vrot.slane %v2367_v23, %v2364_v22  ;;  %2097 = vmatprep.subr.bf16.mxu1 %v2096_v34  ;;  %v2108_v43 = vpack.c.bf16 %v584_v42, %v583_v41  ;;  %v2390_v49 = vsub.s32 0, %v2361_v20  ;;  %v2393_v50 = vsub.s32 4, %v2361_v20 }
  0x1c   : > { %2099 = vmatpush3.bf16.msra.mxu1 %v2096_v34  ;;  %v462_v48 = vand.u32 7, %v450_v45  ;;  %v2396_v51 = vsub.s32 1, %v2361_v20  ;;  %v2399_v52 = vsub.s32 2, %v2361_v20  ;;  %v546_v54 = vrot.slane %v2367_v23, %v2386_v46 }
  0x1d   : > { %2095 = vmatpush3.bf16.msra.mxu0 %v2092_v13  ;;  %2101 = vmatprep.subr.bf16.mxu1 %v2100_v36  ;;  %vm490_vm4 = vcmp.lt.s32.totalorder %v455_v47, 3  ;;  %v488_v57 = vrot.slane %v2367_v23, %v2393_v50  ;;  %v497_v58 = vrot.slane %v2367_v23, %v2390_v49  ;;  %vm502_vm7 = vcmp.lt.s32.totalorder %v455_v47, 2 }
  0x1e   : > { %346 = vadd.xlane.f32.xlu0 %v345_v7  ;;  %2046 = vmatprep.subr.msk.mxu0 %vm589_vm2, %v335_v39  ;;  %vm491_vm5 = vcmp.lt.s32.totalorder %v462_v48, 3  ;;  %vm503_vm8 = vcmp.lt.s32.totalorder %v462_v48, 2  ;;  %v518_v60 = vrot.slane %v2367_v23, %v2396_v51  ;;  %vm523_vm10 = vcmp.lt.s32.totalorder %v455_v47, 1 }
  0x1f   : > { %vm524_vm11 = vcmp.lt.s32.totalorder %v462_v48, 1  ;;  %v538_v61 = vrot.slane %v2367_v23, %v2399_v52 }
  0x20   : > { %2103 = vmatpush3.bf16.msra.mxu1 %v2100_v36 }
  0x21   : > { %2105 = vmatprep.subr.bf16.mxu1 %v2104_v40 }
  0x24   : > { %2107 = vmatpush3.bf16.msra.mxu1 %v2104_v40 }
  0x25   : > { %2109 = vmatprep.subr.bf16.mxu1 %v2108_v43 }
  0x28   : > { %2111 = vmatpush3.bf16.msra.mxu1 %v2108_v43 }
  0xa7   : > { %v344_v14 = vpop.xlane.xlu0 %343 }
  0xa8   : > { %v349_v15 = vmul.f32 0.03125, %v344_v14 }
  0xaa   : > { %v351_v17 = vadd.f32 1e-05, %v349_v15 }
  0xab   : > { %v347_v18 = vpop.xlane.xlu0 %346 }
  0xac   : > { %2186 = vrsqrt.f32 %v351_v17  ;;  %v350_v19 = vmul.f32 0.03125, %v347_v18 }
  0xae   : > { %v352_v21 = vadd.f32 1e-05, %v350_v19 }
  0xb0   : > { %2188 = vrsqrt.f32 %v352_v21 }
  0xb6   : > { %v2187_v25 = vpop.eup %2186 }
  0xb7   : > { %v355_v26 = vmul.f32 %v2187_v25, %v333_v2 }
  0xb9   : > { %v361_v27 = vmul.f32 %v360_v24, %v355_v26 }
  0xba   : > { %v2189_v28 = vpop.eup %2188 }
  0xbb   : > { %v356_v29 = vmul.f32 %v2189_v28, %v334_v3  ;;  %2024 = vmatprep.mubr.msk.f32.mxu0 %vm341_vm1, %v361_v27 }
  0xbd   : > { %v362_v30 = vmul.f32 %v360_v24, %v356_v29 }
  0xbf   : > { %2025 = vmatmul.mubr.msk.f32.vlgmr.msra.gmra.mrb[0].mxu0 %vm341_vm1, %v362_v30 }
  0xc0   : > { %2047 = vmatpush3.xpose.msk.msra.mxu0 %vm589_vm2, %v335_v39 }
  0xc1   : > { %2112 = vmatprep.subr.bf16.mxu0 %v2261_v44 }
 0x192   : > { %v2401_v53 = vpop.f32.mrb[0].mxu0 }
 0x193   : > { %v479_v55 = vrot.slane %v2401_v53, 5  ;;  %v2406_v56 = vpop.f32.mrb[1].mxu0 }
 0x194   : > { %v478_v59 = vrot.slane %v2406_v56, 5 }
 0x195   : > { %v509_v62 = vrot.slane %v479_v55, 1  ;;  %v529_v1 = vrot.slane %v479_v55, 2  ;;  %v549_v9 = vmul.f32 %v546_v54, %v479_v55 }
 0x196   : > { %v480_v63 = vsel %vm477_vm3, %v478_v59, %v479_v55  ;;  %v484_v0 = vsel %vm477_vm3, 0.0, %v478_v59  ;;  %v2263_v59 = vmov 0.0   ;;  %vm1137_vm3 = vcmask 516096  }
 0x197   : > { %v492_v2 = vsel %vm490_vm4, 0.0, %v484_v0  ;;  %v493_v3 = vsel %vm491_vm5, 0.0, %v480_v63  ;;  %v506_v4 = vrot.slane %v484_v0, 1  ;;  %v507_v7 = vrot.slane %v480_v63, 1 }
 0x198   : > { %v498_v5 = vmul.f32 %v497_v58, %v492_v2  ;;  %v499_v6 = vmul.f32 %v497_v58, %v493_v3  ;;  %v526_v8 = vrot.slane %v484_v0, 2  ;;  %v527_v10 = vrot.slane %v480_v63, 2 }
 0x199   : > { %v547_v11 = vmul.f32 %v546_v54, %v484_v0  ;;  %v548_v12 = vmul.f32 %v546_v54, %v480_v63  ;;  %v508_v15 = vsel %vm505_vm6, %v506_v4, %v507_v7  ;;  %v510_v16 = vsel %vm505_vm6, %v507_v7, %v509_v62 }
 0x19a   : > { %v500_v13 = vadd.f32 %v498_v5, %v488_v57  ;;  %v501_v14 = vadd.f32 %v499_v6, %v488_v57  ;;  %v513_v17 = vsel %vm502_vm7, 0.0, %v508_v15  ;;  %v514_v18 = vsel %vm503_vm8, 0.0, %v510_v16 }
 0x19b   : > { %v528_v19 = vsel %vm525_vm9, %v526_v8, %v527_v10  ;;  %v530_v21 = vsel %vm525_vm9, %v527_v10, %v529_v1  ;;  %v519_v24 = vmul.f32 %v518_v60, %v513_v17  ;;  %v520_v25 = vmul.f32 %v518_v60, %v514_v18  ;;  %v336_v60 = vld [vmem:[%s2350_s17 + $0x8] sm:$0xff] }
 0x19c   : > { %v533_v26 = vsel %vm523_vm10, 0.0, %v528_v19  ;;  %v534_v27 = vsel %vm524_vm11, 0.0, %v530_v21  ;;  %v557_v28 = vrot.slane %v549_v9, 3  ;;  %v554_v29 = vrot.slane %v547_v11, 3 }
 0x19d   : > { %v555_v30 = vrot.slane %v548_v12, 3  ;;  %v521_v31 = vadd.f32 %v519_v24, %v500_v13  ;;  %v522_v32 = vadd.f32 %v520_v25, %v501_v14  ;;  %v539_v33 = vmul.f32 %v538_v61, %v533_v26 }
 0x19e   : > { %v540_v34 = vmul.f32 %v538_v61, %v534_v27  ;;  %v2264_v61 = vmov 0   ;;  %v2265_v62 = vmov 1   ;;  %v2450_v63 = vsub.s32 5, %v2361_v20 }
 0x19f   : > { %v556_v35 = vsel %vm553_vm12, %v554_v29, %v555_v30  ;;  %v558_v36 = vsel %vm553_vm12, %v555_v30, %v557_v28  ;;  %v541_v37 = vadd.f32 %v539_v33, %v521_v31  ;;  %2169 = vset.pattern.permute.xlu0 %v2264_v61  ;;  %2170 = vset.pattern.permute.xlu1 %v2265_v62  ;;  %v1965_v21 = vmul.f32 -1.442695, %v2401_v53 }
 0x1a0   : > { %v542_v38 = vadd.f32 %v540_v34, %v522_v32  ;;  %v588_v0 = vrot.slane %v2367_v23, %v2450_v63  ;;  %v2483_v25 = vsub.s32 6, %v2361_v20  ;;  %v2266_v27 = vmov 3  }
 0x1a1   : > { %v561_v39 = vadd.f32 %v556_v35, %v541_v37  ;;  %v2267_v32 = vmov 6  }
 0x1a2   : > { %v562_v40 = vadd.f32 %v558_v36, %v542_v38  ;;  %v2268_v36 = vmov 8  }
 0x1a3   : > { %v1954_v41 = vmul.f32 -1.442695, %v561_v39 }
 0x1a4   : > { %v1955_v42 = vmul.f32 -1.442695, %v562_v40 }
 0x1a5   : > { %2190 = vpow2.f32 %v1954_v41 }
 0x1a6   : > { %2192 = vpow2.f32 %v1955_v42 }
 0x1af   : > { %v2191_v43 = vpop.eup %2190 }
 0x1b0   : > { %v2193_v44 = vpop.eup %2192  ;;  %v569_v45 = vadd.f32 1.0, %v2191_v43 }
 0x1b1   : > { %v570_v47 = vadd.f32 1.0, %v2193_v44 }
 0x1b2   : > { %2194 = vrcp.f32 %v569_v45 }
 0x1b3   : > { %2196 = vrcp.f32 %v570_v47 }
 0x1bc   : > { %v2195_v48 = vpop.eup %2194 }
 0x1bd   : > { %v2197_v54 = vpop.eup %2196  ;;  %v2431_v55 = vmul.f32 %v2195_v48, %v561_v39 }
 0x1be   : > { %v2433_v57 = vmul.f32 %v2197_v54, %v562_v40 }
 0x1bf   : > { %2043 = vmatprep.mubr.msk.f32.mxu1 %vm589_vm2, %v2431_v55  ;;  %2048 = vmatprep.mubr.msk.f32.mxu0 %vm589_vm2, %v2431_v55 }
 0x1c0   : > { %2044 = vmatmul.mubr.msk.f32.vlgmr.msra.gmra.mrb[0].mxu1 %vm589_vm2, %v2433_v57  ;;  %2049 = vmatmul.mubr.msk.f32.vlgmr.msra.gmra.mrb[2].mxu0 %vm589_vm2, %v2433_v57  ;;  %v2113_v58 = vpack.c.bf16 %v2433_v57, %v2431_v55 }
 0x1c1   : > { %2055 = vmatprep.mubr.msk.f32.mxu0 %vm2262_vm14, %v2263_v59 }
 0x1c2   : > { %2115 = vmatpush3.bf16.xpose.msk.msra.mxu0 %vm2114_vm13, %v2113_v58 }
 0x1c9   : > { %2056 = vmatmul.mubr.msk.f32.vlgmr.msra.gmra.mrb[4].mxu0 %vm589_vm2, %v336_v60  ;;  %v2270_v60 = vmov 14  }
 0x293   : > { %v2045_v1 = vpop.f32.mrb[0].mxu1  ;;  %v2454_v2 = vpop.f32.mrb[2].mxu0 }
 0x294   : > { %v2456_v3 = vadd.f32 %v2045_v1, %v588_v0  ;;  %v662_v4 = vpop.f32.mrb[1].mxu1  ;;  %v2458_v5 = vpop.f32.mrb[3].mxu0  ;;  %v1389_v6 = vrot.slane %v2454_v2, %v2393_v50  ;;  %v1361_v7 = vrot.slane %v2454_v2, %v2390_v49  ;;  %v1396_v11 = vrot.slane %v2454_v2, %v2450_v63 }
 0x295   : > { %v2464_v8 = vadd.f32 %v662_v4, %v588_v0  ;;  %v1368_v12 = vrot.slane %v2454_v2, %v2396_v51  ;;  %v1375_v16 = vrot.slane %v2454_v2, %v2399_v52  ;;  %v978_v17 = vrot.slane %v2458_v5, %v2396_v51 }
 0x296   : > { %v674_v9 = vand.u32 2147483647, %v2456_v3  ;;  %1391 = vbcast.lane.b32.xlu0 %v1389_v6, 256  ;;  %1363 = vbcast.lane.b32.xlu1 %v1361_v7, 256  ;;  %v1382_v24 = vrot.slane %v2454_v2, %v2386_v46  ;;  %v1403_v51 = vrot.slane %v2454_v2, %v2483_v25  ;;  %v971_v31 = vrot.slane %v2458_v5, %v2390_v49 }
 0x297   : > { %v673_v23 = vand.u32 2147483647, %v2464_v8  ;;  %v985_v33 = vrot.slane %v2458_v5, %v2399_v52  ;;  %v992_v37 = vrot.slane %v2458_v5, %v2386_v46  ;;  %v999_v41 = vrot.slane %v2458_v5, %v2393_v50 }
 0x298   : > { %v676_v10 = vsub.f32 0.0, %v674_v9  ;;  %v2269_v52 = vmov 11   ;;  %v1006_v54 = vrot.slane %v2458_v5, %v2450_v63  ;;  %v1013_v62 = vrot.slane %v2458_v5, %v2483_v25 }
 0x299   : > { %v675_v13 = vsub.f32 0.0, %v673_v23  ;;  %v2271_v0 = vmov 1966171168   ;;  %v672_v4 = vmax.f32 %v2456_v3, 0.0  ;;  %v671_v63 = vmax.f32 %v2464_v8, 0.0 }
 0x29a   : > { %v679_v14 = vmul.f32 1.442695, %v676_v10  ;;  %1398 = vbcast.lane.b32.xlu0 %v1396_v11, 256  ;;  %1370 = vbcast.lane.b32.xlu1 %v1368_v12, 256  ;;  %v857_v1 = vunpack.c.l.s4 %v2271_v0  ;;  %v1410_v6 = vrot.slane %v2454_v2, %v2364_v22  ;;  %v2272_v10 = vmov 15  }
 0x29b   : > { %v677_v15 = vmul.f32 1.442695, %v675_v13  ;;  %v2274_v13 = vmov 2  }
 0x29c   : > { %2198 = vpow2.f32 %v679_v14  ;;  %v2476_v18 = vpop.f32.mrb[4].mxu0  ;;  %v858_v11 = vunpack.c.0.s8 %v857_v1 }
 0x29d   : > { %2200 = vpow2.f32 %v677_v15  ;;  %v2057_v19 = vpop.f32.mrb[5].mxu0 }
 0x29e   : > { %1377 = vbcast.lane.b32.xlu1 %v1375_v16, 256  ;;  %980 = vbcast.lane.b32.xlu0 %v978_v17, 256  ;;  %2202 = vpow2.f32 %v1965_v21  ;;  %v2520_v8 = vsub.s32 %v858_v11, %v2361_v20  ;;  %v2275_v17 = vmov 4   ;;  %v2276_v21 = vmov 5  }
 0x2a2   : > { %1384 = vbcast.lane.b32.xlu1 %v1382_v24, 256  ;;  %1126 = vperm.xlu0 %2169, %v2476_v18   ;;  %v1964_v24 = vmul.f32 -1.442695, %v2406_v56 }
 0x2a6   : > { %v2199_v26 = vpop.eup %2198  ;;  %1405 = vbcast.lane.b32.xlu1 %v1403_v51, 256  ;;  %2172 = vset.pattern.permute.xlu0 %v2266_v27  ;;  %v2277_v27 = vmov 7  }
 0x2a7   : > { %v2201_v28 = vpop.eup %2200  ;;  %v690_v29 = vadd.f32 1.0, %v2199_v26  ;;  %1172 = vperm.xlu0 %2172, %v2476_v18   ;;  %v693_v38 = vmul.f32 -0.5, %v2199_v26  ;;  %v696_v45 = vand.u32 2147483647, %v2199_v26 }
 0x2a8   : > { %v681_v30 = vadd.f32 1.0, %v2201_v28  ;;  %v2203_v34 = vpop.eup %2202  ;;  %v684_v39 = vmul.f32 -0.5, %v2201_v28  ;;  %v687_v46 = vand.u32 2147483647, %v2201_v28 }
 0x2a9   : > { %2204 = vlog2.f32 %v690_v29  ;;  %v1649_v35 = vadd.f32 1.0, %v2203_v34  ;;  %v694_v43 = vadd.f32 1.0, %v693_v38  ;;  %vm697_vm15 = vcmp.lt.f32.partialorder %v696_v45, 0.0004427343 }
 0x2aa   : > { %973 = vbcast.lane.b32.xlu1 %v971_v31, 256  ;;  %2206 = vlog2.f32 %v681_v30  ;;  %v685_v44 = vadd.f32 1.0, %v684_v39  ;;  %vm688_vm0 = vcmp.lt.f32.partialorder %v687_v46, 0.0004427343  ;;  %v2546_v30 = vld [vmem:[%s2350_s17 + $0x10] sm:$0xff]  ;;  %v2279_v34 = vmov 10  }
 0x2ab   : > { %2175 = vset.pattern.permute.xlu0 %v2267_v32  ;;  %2208 = vrcp.f32 %v1649_v35  ;;  %v695_v58 = vmul.f32 %v2199_v26, %v694_v43  ;;  %v2281_v39 = vmov 13  }
 0x2ac   : > { %1217 = vperm.xlu0 %2175, %v2476_v18   ;;  %v686_v59 = vmul.f32 %v2201_v28, %v685_v44  ;;  %2210 = vpow2.f32 %v1964_v24 }
 0x2ae   : > { %987 = vbcast.lane.b32.xlu1 %v985_v33, 256  ;;  %v2278_v33 = vmov 9  }
 0x2b0   : > { %2177 = vset.pattern.permute.xlu0 %v2268_v36 }
 0x2b1   : > { %1515 = vperm.xlu0 %2177, %v2476_v18  }
 0x2b2   : > { %994 = vbcast.lane.b32.xlu1 %v992_v37, 256  ;;  %v2280_v37 = vmov 12  }
 0x2b3   : > { %v2205_v40 = vpop.eup %2204 }
 0x2b4   : > { %v2207_v42 = vpop.eup %2206  ;;  %v692_v47 = vmul.f32 0.6931472, %v2205_v40 }
 0x2b5   : > { %2180 = vset.pattern.permute.xlu0 %v2269_v52  ;;  %v683_v48 = vmul.f32 0.6931472, %v2207_v42  ;;  %v2209_v7 = vpop.eup %2208  ;;  %v1020_v52 = vrot.slane %v2458_v5, %v2364_v22 }
 0x2b6   : > { %1001 = vbcast.lane.b32.xlu1 %v999_v41, 256  ;;  %1560 = vperm.xlu0 %2180, %v2476_v18   ;;  %v698_v50 = vsel %vm697_vm15, %v695_v58, %v692_v47  ;;  %v1655_v12 = vmul.f32 %v2209_v7, %v2401_v53  ;;  %v2211_v35 = vpop.eup %2210 }
 0x2b7   : > { %v689_v61 = vsel %vm688_vm0, %v686_v59, %v683_v48  ;;  %v2508_v9 = vadd.f32 %v698_v50, %v672_v4  ;;  %v1648_v36 = vadd.f32 1.0, %v2211_v35 }
 0x2b8   : > { %v2510_v23 = vadd.f32 %v689_v61, %v671_v63 }
 0x2b9   : > { %v1245_v3 = vcombine.high %v2508_v9, %v2508_v9  ;;  %2212 = vrcp.f32 %v1648_v36  ;;  %v1252_v38 = vrot.slane %v2508_v9, %v2520_v8  ;;  %v702_v22 = vmul.f32 %v2508_v9, %v2433_v57 }
 0x2ba   : > { %1008 = vbcast.lane.b32.xlu1 %v1006_v54, 256  ;;  %2183 = vset.pattern.permute.xlu0 %v2270_v60  ;;  %v855_v2 = vcombine.high %v2510_v23, %v2510_v23  ;;  %v862_v5 = vrot.slane %v2510_v23, %v2520_v8 }
 0x2bb   : > { %1605 = vperm.xlu0 %2183, %v2476_v18   ;;  %v1259_v14 = vrot.slane %v1245_v3, %v2520_v8  ;;  %v1268_v40 = vrot.slane %v1252_v38, %v2520_v8  ;;  %v1260_v41 = vcombine.high %v1252_v38, %v1252_v38 }
 0x2bc   : > { %v2524_v53 = vrot.slane %v855_v2, %v2520_v8  ;;  %v878_v0 = vrot.slane %v862_v5, %v2520_v8  ;;  %v870_v1 = vcombine.high %v862_v5, %v862_v5 }
 0x2bd   : > { %v1261_v15 = vcombine.high %v1259_v14, %v1259_v14  ;;  %v1297_v42 = vrot.slane %v1268_v40, %v2390_v49  ;;  %v1282_v44 = vrot.slane %v1260_v41, %v2520_v8  ;;  %v1290_v47 = vcombine.high %v1268_v40, %v1268_v40 }
 0x2be   : > { %1015 = vbcast.lane.b32.xlu1 %v1013_v62, 256  ;;  %v871_v16 = vcombine.high %v2524_v53, %v2524_v53  ;;  %v1422_v62 = vrot.slane %v702_v22, %v2520_v8 }
 0x2bf   : > { %1412 = vbcast.lane.b32.xlu0 %v1410_v6, 256  ;;  %v2531_v20 = vrot.slane %v1261_v15, %v2520_v8  ;;  %v1334_v45 = vmul.f32 %v1297_v42, %v2546_v30  ;;  %v1301_v48 = vrot.slane %v1282_v44, %v2390_v49  ;;  %v1305_v58 = vrot.slane %v1290_v47, %v2390_v49 }
 0x2c0   : > { %2185 = vset.pattern.permute.xlu0 %v2272_v10  ;;  %v2534_v19 = vrot.slane %v871_v16, %v2520_v8  ;;  %v1438_v7 = vrot.slane %v1422_v62, %v2520_v8  ;;  %v1430_v9 = vcombine.high %v1422_v62, %v1422_v62 }
 0x2c1   : > { %v1293_v51 = vcombine.high %v2531_v20, %v2531_v20  ;;  %v1342_v54 = vmul.f32 1.442695, %v1334_v45  ;;  %v1335_v59 = vmul.f32 %v1301_v48, %v2546_v30  ;;  %v1336_v61 = vmul.f32 %v1305_v58, %v2546_v30 }
 0x2c2   : > { %1142 = vperm.xlu1 %2170, %v2476_v18   ;;  %v903_v26 = vcombine.high %v2534_v19, %v2534_v19  ;;  %v1317_v2 = vrot.slane %v2531_v20, %v2390_v49  ;;  %v1467_v15 = vrot.slane %v1438_v7, %v2390_v49  ;;  %v1452_v16 = vrot.slane %v1430_v9, %v2520_v8  ;;  %v1670_v9 = vld [vmem:[%s2345_s14 + $0x20] sm:$0xff] }
 0x2c3   : > { %1660 = vrot.lane.b32.xlu0 %v1655_v12, %s2273_s22  ;;  %v1325_v28 = vrot.slane %v1293_v51, %v2390_v49  ;;  %v2213_v43 = vpop.eup %2212  ;;  %2214 = vpow2.f32 %v1342_v54  ;;  %v1344_v50 = vmul.f32 1.442695, %v1335_v59  ;;  %v1346_v63 = vmul.f32 1.442695, %v1336_v61 }
 0x2c4   : > { %v935_v29 = vrot.slane %v903_v26, %v2390_v49  ;;  %v1654_v46 = vmul.f32 %v2213_v43, %v2406_v56  ;;  %v1275_v56 = vrot.slane %v1259_v14, %v2520_v8  ;;  %v892_v12 = vrot.slane %v870_v1, %v2520_v8 }
 0x2c5   : > { %v2549_v31 = vmul.f32 %v1325_v28, %v2546_v30  ;;  %2216 = vpow2.f32 %v1344_v50  ;;  %v1339_v20 = vmul.f32 %v1317_v2, %v2546_v30  ;;  %v1471_v35 = vrot.slane %v1452_v16, %v2390_v49  ;;  %v1668_v50 = vld [vmem:[%s2345_s14 + $0x10] sm:$0xff] }
 0x2c6   : > { %2171 = vset.pattern.permute.xlu1 %v2274_v13  ;;  %v2552_v32 = vmul.f32 %v935_v29, %v2546_v30  ;;  %v1313_v4 = vrot.slane %v1275_v56, %v2390_v49  ;;  %v1291_v11 = vcombine.high %v1275_v56, %v1275_v56  ;;  %2218 = vpow2.f32 %v1346_v63  ;;  %v1666_v56 = vld [vmem:[%s2345_s14] sm:$0xff]  ;;  %v1669_v63 = vld [vmem:[%s2345_s14 + $0x18] sm:$0xff] }
 0x2c7   : > { %1157 = vperm.xlu1 %2171, %v2476_v18   ;;  %v911_v51 = vrot.slane %v892_v12, %v2390_v49  ;;  %v1460_v36 = vcombine.high %v1438_v7, %v1438_v7  ;;  %v902_v38 = vcombine.high %v892_v12, %v892_v12  ;;  %v2603_v45 = vmul.f32 %v2510_v23, %v2431_v55 }
 0x2c8   : > { %v1338_v13 = vmul.f32 %v1313_v4, %v2546_v30  ;;  %v1321_v28 = vrot.slane %v1291_v11, %v2390_v49  ;;  %v2612_v59 = vrot.slane %v2524_v53, %v2520_v8  ;;  %v2120_v7 = vpack.c.bf16 %v1669_v63, %v1668_v50 }
 0x2c9   : > { %v945_v43 = vmul.f32 %v911_v51, %v2546_v30  ;;  %v1475_v54 = vrot.slane %v1460_v36, %v2390_v49  ;;  %v1032_v53 = vrot.slane %v2603_v45, %v2520_v8 }
 0x2ca   : > { %v1350_v29 = vmul.f32 1.442695, %v1338_v13 }
 0x2cb   : > { %2173 = vset.pattern.permute.xlu1 %v2275_v17  ;;  %v900_v17 = vcombine.high %v878_v0, %v878_v0  ;;  %v954_v1 = vmul.f32 1.442695, %v945_v43  ;;  %v1040_v51 = vcombine.high %v1032_v53, %v1032_v53  ;;  %v1048_v36 = vrot.slane %v1032_v53, %v2520_v8 }
 0x2cc   : > { %1187 = vperm.xlu1 %2173, %v2476_v18  }
 0x2cd   : > { %v2215_v3 = vpop.eup %2214 }
 0x2d0   : > { %2174 = vset.pattern.permute.xlu1 %v2276_v21 }
 0x2d1   : > { %1202 = vperm.xlu1 %2174, %v2476_v18  }
 0x2d5   : > { %2176 = vset.pattern.permute.xlu1 %v2277_v27  ;;  %v1512_v27 = vmul.f32 0.0, %v2215_v3 }
 0x2d6   : > { %1232 = vperm.xlu1 %2176, %v2476_v18  }
 0x2da   : > { %2178 = vset.pattern.permute.xlu1 %v2278_v33  ;;  %v1415_v33 = vcombine.high %v702_v22, %v702_v22  ;;  %v919_v22 = vrot.slane %v902_v38, %v2390_v49 }
 0x2db   : > { %1530 = vperm.xlu1 %2178, %v2476_v18  }
 0x2dc   : > { %v1429_v47 = vrot.slane %v1415_v33, %v2520_v8 }
 0x2de   : > { %v1445_v11 = vrot.slane %v1429_v47, %v2520_v8  ;;  %v1431_v12 = vcombine.high %v1429_v47, %v1429_v47 }
 0x2df   : > { %2179 = vset.pattern.permute.xlu1 %v2279_v34 }
 0x2e0   : > { %1545 = vperm.xlu1 %2179, %v2476_v18  }
 0x2e4   : > { %2181 = vset.pattern.permute.xlu1 %v2280_v37  ;;  %v2217_v37 = vpop.eup %2216 }
 0x2e5   : > { %1575 = vperm.xlu1 %2181, %v2476_v18   ;;  %v2219_v58 = vpop.eup %2218 }
 0x2e9   : > { %2182 = vset.pattern.permute.xlu1 %v2281_v39  ;;  %v915_v39 = vrot.slane %v900_v17, %v2390_v49 }
 0x2ea   : > { %1590 = vperm.xlu1 %2182, %v2476_v18  }
 0x2eb   : > { %v946_v5 = vmul.f32 %v915_v39, %v2546_v30  ;;  %v901_v39 = vcombine.high %v2612_v59, %v2612_v59 }
 0x2ee   : > { %2184 = vset.pattern.permute.xlu1 %v2272_v10  ;;  %v907_v10 = vrot.slane %v878_v0, %v2390_v49 }
 0x2ef   : > { %1620 = vperm.xlu1 %2184, %v2476_v18   ;;  %v1292_v18 = vcombine.high %v1282_v44, %v1282_v44  ;;  %v1352_v44 = vmul.f32 1.442695, %v1339_v20  ;;  %v1673_v20 = vld [vmem:[%s2345_s14 + $0x38] sm:$0xff] }
 0x2f0   : > { %v944_v24 = vmul.f32 %v907_v10, %v2546_v30  ;;  %v1671_v10 = vld [vmem:[%s2345_s14 + $0x28] sm:$0xff] }
 0x2f1   : > { %v1309_v60 = vrot.slane %v1292_v18, %v2390_v49  ;;  %v1462_v18 = vcombine.high %v1452_v16, %v1452_v16  ;;  %v956_v16 = vmul.f32 1.442695, %v946_v5 }
 0x2f2   : > { %v952_v41 = vmul.f32 1.442695, %v944_v24  ;;  %v2124_v24 = vpack.c.bf16 %v1671_v10, %v1670_v9 }
 0x2f3   : > { %1022 = vbcast.lane.b32.xlu1 %v1020_v52, 256  ;;  %v1337_v6 = vmul.f32 %v1309_v60, %v2546_v30  ;;  %v1667_v60 = vld [vmem:[%s2345_s14 + $0x8] sm:$0xff]  ;;  %v1479_v2 = vrot.slane %v1462_v18, %v2390_v49 }
 0x2f4   : > { %v2116_v4 = vpack.c.bf16 %v1667_v60, %v1666_v56 }
 0x2f5   : > { %v1348_v14 = vmul.f32 1.442695, %v1337_v6 }
 0x2f6   : > { %2117 = vmatprep.subr.bf16.mxu1 %v2116_v4 }
 0x2f7   : > { %1658 = vrot.lane.b32.xlu1 %v1654_v46, %s2273_s22  ;;  %2220 = vpow2.f32 %v1348_v14  ;;  %v1340_v46 = vmul.f32 %v1321_v28, %v2546_v30  ;;  %v923_v14 = vrot.slane %v2612_v59, %v2390_v49  ;;  %2119 = vmatpush3.bf16.msra.mxu1 %v2116_v4  ;;  %v1672_v28 = vld [vmem:[%s2345_s14 + $0x30] sm:$0xff] }
 0x2f8   : > { %2222 = vpow2.f32 %v1350_v29  ;;  %2121 = vmatprep.subr.bf16.mxu1 %v2120_v7  ;;  %v1483_v29 = vrot.slane %v1445_v11, %v2390_v49  ;;  %v2128_v43 = vpack.c.bf16 %v1673_v20, %v1672_v28 }
 0x2f9   : > { %2224 = vpow2.f32 %v952_v41  ;;  %v1354_v6 = vmul.f32 1.442695, %v1340_v46  ;;  %v1461_v41 = vcombine.high %v1445_v11, %v1445_v11  ;;  %v1062_v46 = vrot.slane %v1040_v51, %v2520_v8 }
 0x2fa   : > { %2226 = vpow2.f32 %v1352_v44 }
 0x2fb   : > { %2228 = vpow2.f32 %v954_v1  ;;  %2123 = vmatpush3.bf16.msra.mxu1 %v2120_v7  ;;  %v1025_v7 = vcombine.high %v2603_v45, %v2603_v45 }
 0x2fc   : > { %2230 = vpow2.f32 %v1354_v6  ;;  %2125 = vmatprep.subr.bf16.mxu1 %v2124_v24  ;;  %v1070_v6 = vcombine.high %v1048_v36, %v1048_v36 }
 0x2fd   : > { %2232 = vpow2.f32 %v956_v16 }
 0x2fe   : > { %v1085_v45 = vrot.slane %v1070_v6, %v2390_v49 }
 0x2ff   : > { %2127 = vmatpush3.bf16.msra.mxu1 %v2124_v24 }
 0x300   : > { %2129 = vmatprep.subr.bf16.mxu1 %v2128_v43 }
 0x301   : > { %v2221_v13 = vpop.eup %2220 }
 0x302   : > { %v2223_v38 = vpop.eup %2222 }
 0x303   : > { %v2225_v44 = vpop.eup %2224  ;;  %2131 = vmatpush3.bf16.msra.mxu1 %v2128_v43 }
 0x304   : > { %v2227_v59 = vpop.eup %2226 }
 0x305   : > { %v2229_v63 = vpop.eup %2228 }
 0x306   : > { %v2231_v10 = vpop.eup %2230 }
 0x307   : > { %v2233_v51 = vpop.eup %2232 }
 0x308   : > { %v1364_v21 = vpop.permute.xlu1 %1363  ;;  %v1392_v61 = vpop.permute.xlu0 %1391 }
 0x309   : > { %v1504_v26 = vmul.f32 %v1467_v15, %v1364_v21 }
 0x30b   : > { %v2595_v34 = vadd.f32 %v1512_v27, %v1504_v26  ;;  %v947_v26 = vmul.f32 %v919_v22, %v2546_v30  ;;  %v1356_v27 = vmul.f32 1.442695, %v2549_v31  ;;  %v931_v22 = vrot.slane %v901_v39, %v2390_v49 }
 0x30c   : > { %v1371_v40 = vpop.permute.xlu1 %1370  ;;  %v1399_v33 = vpop.permute.xlu0 %1398 }
 0x30d   : > { %v1505_v42 = vmul.f32 %v1471_v35, %v1371_v40  ;;  %v1527_v52 = vmul.f32 %v2217_v37, %v2595_v34  ;;  %v2638_v35 = vrot.slane %v1431_v12, %v2520_v8  ;;  %v927_v40 = vrot.slane %v2534_v19, %v2390_v49 }
 0x30e   : > { %v958_v47 = vmul.f32 1.442695, %v947_v26  ;;  %2234 = vpow2.f32 %v1356_v27  ;;  %v1077_v19 = vrot.slane %v1048_v36, %v2390_v49  ;;  %v1072_v12 = vcombine.high %v1062_v46, %v1062_v46 }
 0x30f   : > { %v2607_v48 = vadd.f32 %v1527_v52, %v1505_v42  ;;  %v1508_v42 = vmul.f32 %v1483_v29, %v1392_v61  ;;  %v1487_v18 = vrot.slane %v2638_v35, %v2390_v49  ;;  %v1122_v61 = vmul.f32 0.0, %v2225_v44 }
 0x310   : > { %v1378_v23 = vpop.permute.xlu1 %1377  ;;  %v981_v60 = vpop.permute.xlu0 %980  ;;  %2236 = vpow2.f32 %v958_v47  ;;  %v949_v4 = vmul.f32 %v927_v40, %v2546_v30  ;;  %v950_v24 = vmul.f32 %v931_v22, %v2546_v30  ;;  %v1039_v27 = vrot.slane %v1025_v7, %v2520_v8 }
 0x311   : > { %v1506_v62 = vmul.f32 %v1475_v54, %v1378_v23  ;;  %v1542_v0 = vmul.f32 %v2219_v58, %v2607_v48  ;;  %v948_v54 = vmul.f32 %v923_v14, %v2546_v30  ;;  %v1491_v23 = vrot.slane %v1461_v41, %v2390_v49 }
 0x312   : > { %v1509_v56 = vmul.f32 %v1487_v18, %v1399_v33  ;;  %v1089_v30 = vrot.slane %v1072_v12, %v2390_v49  ;;  %v964_v41 = vmul.f32 1.442695, %v950_v24  ;;  %v1055_v43 = vrot.slane %v1039_v27, %v2520_v8 }
 0x313   : > { %v2626_v3 = vadd.f32 %v1542_v0, %v1506_v62  ;;  %v1081_v0 = vrot.slane %v1062_v46, %v2390_v49  ;;  %v960_v1 = vmul.f32 1.442695, %v948_v54  ;;  %v1041_v44 = vcombine.high %v1039_v27, %v1039_v27 }
 0x314   : > { %v1385_v15 = vpop.permute.xlu1 %1384 }
 0x315   : > { %v1507_v17 = vmul.f32 %v1479_v2, %v1385_v15  ;;  %v1557_v21 = vmul.f32 %v2221_v13, %v2626_v3  ;;  %v1115_v2 = vmul.f32 %v1081_v0, %v981_v60  ;;  %2238 = vpow2.f32 %v960_v1 }
 0x317   : > { %v2641_v37 = vadd.f32 %v1557_v21, %v1507_v17  ;;  %v962_v21 = vmul.f32 1.442695, %v949_v4 }
 0x318   : > { %v1406_v31 = vpop.permute.xlu1 %1405  ;;  %v2235_v20 = vpop.eup %2234 }
 0x319   : > { %v1572_v52 = vmul.f32 %v2223_v38, %v2641_v37  ;;  %v1510_v13 = vmul.f32 %v1491_v23, %v1406_v31  ;;  %2240 = vpow2.f32 %v962_v21 }
 0x31a   : > { %v2237_v46 = vpop.eup %2236  ;;  %2242 = vpow2.f32 %v964_v41 }
 0x31b   : > { %v2653_v58 = vadd.f32 %v1572_v52, %v1508_v42 }
 0x31c   : > { %v974_v5 = vpop.permute.xlu1 %973 }
 0x31d   : > { %v1114_v50 = vmul.f32 %v1077_v19, %v974_v5  ;;  %v1587_v62 = vmul.f32 %v2227_v59, %v2653_v58  ;;  %v966_v59 = vmul.f32 1.442695, %v2552_v32  ;;  %v1093_v5 = vrot.slane %v1055_v43, %v2390_v49 }
 0x31f   : > { %v1123_v53 = vadd.f32 %v1122_v61, %v1114_v50  ;;  %v2662_v9 = vadd.f32 %v1587_v62, %v1509_v56  ;;  %v2685_v56 = vrot.slane %v1041_v44, %v2520_v8  ;;  %v2239_v50 = vpop.eup %2238  ;;  %2244 = vpow2.f32 %v966_v59 }
 0x320   : > { %v988_v11 = vpop.permute.xlu1 %987  ;;  %v1463_v44 = vcombine.high %v2638_v35, %v2638_v35 }
 0x321   : > { %v1139_v14 = vmul.f32 %v2229_v63, %v1123_v53  ;;  %v1127_v15 = vpop.permute.xlu0 %1126  ;;  %v1602_v16 = vmul.f32 %v2231_v10, %v2662_v9  ;;  %v1116_v36 = vmul.f32 %v1085_v45, %v988_v11  ;;  %v1071_v63 = vcombine.high %v1055_v43, %v1055_v43 }
 0x322   : > { %v1129_v17 = vmul.f32 %v1127_v15, %v1123_v53  ;;  %v1097_v7 = vrot.slane %v2685_v56, %v2390_v49 }
 0x323   : > { %v2667_v26 = vadd.f32 %v1139_v14, %v1115_v2  ;;  %v2670_v28 = vadd.f32 %v1602_v16, %v1510_v13  ;;  %v2241_v8 = vpop.eup %2240 }
 0x324   : > { %v1130_v29 = vsel %vm589_vm2, %v1129_v17, 0.0  ;;  %v995_v33 = vpop.permute.xlu1 %994  ;;  %v1101_v17 = vrot.slane %v1071_v63, %v2390_v49  ;;  %v2243_v24 = vpop.eup %2242 }
 0x325   : > { %v1154_v38 = vmul.f32 %v2233_v51, %v2667_v26  ;;  %v1131_v39 = vrot.slane %v1130_v29, 4  ;;  %v2675_v40 = vmul.f32 %v2235_v20, %v2670_v28  ;;  %v1117_v18 = vmul.f32 %v1089_v30, %v995_v33 }
 0x326   : > { %v1173_v31 = vpop.permute.xlu0 %1172 }
 0x327   : > { %v2678_v42 = vadd.f32 %v1154_v38, %v1116_v36  ;;  %v1132_v52 = vadd.f32 %v1131_v39, %v1130_v29 }
 0x328   : > { %v1002_v47 = vpop.permute.xlu1 %1001 }
 0x329   : > { %v1133_v54 = vrot.slane %v1132_v52, 2  ;;  %v1169_v19 = vmul.f32 %v2237_v46, %v2678_v42  ;;  %v1118_v0 = vmul.f32 %v1093_v5, %v1002_v47  ;;  %v2245_v39 = vpop.eup %2244 }
 0x32b   : > { %v1134_v22 = vadd.f32 %v1133_v54, %v1132_v52  ;;  %v1170_v23 = vadd.f32 %v1169_v19, %v1117_v18  ;;  %v1218_v60 = vpop.permute.xlu0 %1217 }
 0x32c   : > { %v1009_v61 = vpop.permute.xlu1 %1008 }
 0x32d   : > { %v1135_v62 = vrot.slane %v1134_v22, 1  ;;  %v1184_v1 = vmul.f32 %v2239_v50, %v1170_v23  ;;  %v1175_v4 = vmul.f32 %v1173_v31, %v1170_v23  ;;  %v1119_v12 = vmul.f32 %v1097_v7, %v1009_v61 }
 0x32e   : > { %v1495_v50 = vrot.slane %v1463_v44, %v2390_v49 }
 0x32f   : > { %v1136_v53 = vadd.f32 %v1135_v62, %v1134_v22  ;;  %v2687_v6 = vadd.f32 %v1184_v1, %v1118_v0  ;;  %v1176_v32 = vsel %vm589_vm2, %v1175_v4, 0.0 }
 0x330   : > { %v1177_v10 = vrot.slane %v1176_v32, 4  ;;  %v1516_v11 = vpop.permute.xlu0 %1515  ;;  %v1016_v15 = vpop.permute.xlu1 %1015 }
 0x331   : > { %1138 = vst.msk [vmem:[#allocation3] sm:$0x1] %vm1137_vm3, %v1136_v53  ;;  %v1199_v2 = vmul.f32 %v2241_v8, %v2687_v6  ;;  %v1518_v13 = vmul.f32 %v1516_v11, %v2595_v34  ;;  %v1120_v27 = vmul.f32 %v1101_v17, %v1016_v15 }
 0x332   : > { %v1178_v14 = vadd.f32 %v1177_v10, %v1176_v32 }
 0x333   : > { %v2695_v16 = vadd.f32 %v1199_v2, %v1119_v12  ;;  %v1519_v21 = vsel %vm589_vm2, %v1518_v13, 0.0 }
 0x334   : > { %v1179_v51 = vrot.slane %v1178_v14, 2  ;;  %v1520_v45 = vrot.slane %v1519_v21, 4 }
 0x335   : > { %v1214_v20 = vmul.f32 %v2243_v24, %v2695_v16  ;;  %v1561_v29 = vpop.permute.xlu0 %1560 }
 0x336   : > { %v1180_v33 = vadd.f32 %v1179_v51, %v1178_v14  ;;  %v1521_v36 = vadd.f32 %v1520_v45, %v1519_v21  ;;  %v1563_v38 = vmul.f32 %v1561_v29, %v2641_v37 }
 0x337   : > { %v1215_v34 = vadd.f32 %v1214_v20, %v1120_v27 }
 0x338   : > { %v1181_v30 = vrot.slane %v1180_v33, 1  ;;  %v1522_v31 = vrot.slane %v1521_v36, 2  ;;  %v1564_v41 = vsel %vm589_vm2, %v1563_v38, 0.0 }
 0x339   : > { %v1220_v52 = vmul.f32 %v1218_v60, %v1215_v34  ;;  %v1565_v43 = vrot.slane %v1564_v41, 4  ;;  %v2704_v46 = vmul.f32 %v2245_v39, %v1215_v34 }
 0x33a   : > { %v1182_v47 = vadd.f32 %v1181_v30, %v1180_v33  ;;  %v1523_v54 = vadd.f32 %v1522_v31, %v1521_v36  ;;  %v1606_v18 = vpop.permute.xlu0 %1605 }
 0x33b   : > { %v1221_v19 = vsel %vm589_vm2, %v1220_v52, 0.0  ;;  %v1566_v59 = vadd.f32 %v1565_v43, %v1564_v41  ;;  %v1608_v37 = vmul.f32 %v1606_v18, %v2670_v28 }
 0x33c   : > { %1183 = vst.msk [vmem:[#allocation3 + $0x3] sm:$0x1] %vm1137_vm3, %v1182_v47  ;;  %v1222_v22 = vrot.slane %v1221_v19, 4  ;;  %v1524_v23 = vrot.slane %v1523_v54, 1 }
 0x33d   : > { %v1567_v5 = vrot.slane %v1566_v59, 2  ;;  %v1609_v60 = vsel %vm589_vm2, %v1608_v37, 0.0 }
 0x33e   : > { %v1223_v35 = vadd.f32 %v1222_v22, %v1221_v19  ;;  %v1525_v61 = vadd.f32 %v1524_v23, %v1523_v54  ;;  %v1610_v62 = vrot.slane %v1609_v60, 4  ;;  %v1413_v0 = vpop.permute.xlu0 %1412 }
 0x33f   : > { %v1568_v1 = vadd.f32 %v1567_v5, %v1566_v59  ;;  %v1511_v4 = vmul.f32 %v1495_v50, %v1413_v0 }
 0x340   : > { %v1224_v63 = vrot.slane %v1223_v35, 2  ;;  %1526 = vst.msk [vmem:[#allocation3 + $0x8] sm:$0x1] %vm1137_vm3, %v1525_v61  ;;  %v1611_v53 = vadd.f32 %v1610_v62, %v1609_v60 }
 0x341   : > { %v1569_v28 = vrot.slane %v1568_v1, 1  ;;  %v1143_v32 = vpop.permute.xlu1 %1142  ;;  %v2713_v7 = vadd.f32 %v2675_v40, %v1511_v4 }
 0x342   : > { %v1225_v8 = vadd.f32 %v1224_v63, %v1223_v35  ;;  %v1612_v10 = vrot.slane %v1611_v53, 2  ;;  %v1145_v11 = vmul.f32 %v1143_v32, %v2667_v26 }
 0x343   : > { %v1570_v12 = vadd.f32 %v1569_v28, %v1568_v1 }
 0x344   : > { %v1226_v2 = vrot.slane %v1225_v8, 1  ;;  %v1613_v13 = vadd.f32 %v1612_v10, %v1611_v53  ;;  %v1146_v14 = vsel %vm589_vm2, %v1145_v11, 0.0 }
 0x345   : > { %1571 = vst.msk [vmem:[#allocation3 + $0xb] sm:$0x1] %vm1137_vm3, %v1570_v12  ;;  %v1147_v15 = vrot.slane %v1146_v14, 4 }
 0x346   : > { %v1227_v17 = vadd.f32 %v1226_v2, %v1225_v8  ;;  %v1614_v21 = vrot.slane %v1613_v13, 1  ;;  %v1158_v24 = vpop.permute.xlu1 %1157 }
 0x347   : > { %v1148_v51 = vadd.f32 %v1147_v15, %v1146_v14  ;;  %v1160_v45 = vmul.f32 %v1158_v24, %v2678_v42 }
 0x348   : > { %1228 = vst.msk [vmem:[#allocation3 + $0x6] sm:$0x1] %vm1137_vm3, %v1227_v17  ;;  %v1615_v40 = vadd.f32 %v1614_v21, %v1613_v13 }
 0x349   : > { %v1149_v27 = vrot.slane %v1148_v51, 2  ;;  %v1161_v26 = vsel %vm589_vm2, %v1160_v45, 0.0 }
 0x34a   : > { %1616 = vst.msk [vmem:[#allocation3 + $0xe] sm:$0x1] %vm1137_vm3, %v1615_v40  ;;  %v1162_v20 = vrot.slane %v1161_v26, 4 }
 0x34b   : > { %v1150_v29 = vadd.f32 %v1149_v27, %v1148_v51  ;;  %v1188_v33 = vpop.permute.xlu1 %1187 }
 0x34c   : > { %v1163_v36 = vadd.f32 %v1162_v20, %v1161_v26  ;;  %v1190_v38 = vmul.f32 %v1188_v33, %v2687_v6 }
 0x34d   : > { %v1151_v34 = vrot.slane %v1150_v29, 1 }
 0x34e   : > { %v1164_v39 = vrot.slane %v1163_v36, 2  ;;  %v1191_v30 = vsel %vm589_vm2, %v1190_v38, 0.0 }
 0x34f   : > { %v1152_v31 = vadd.f32 %v1151_v34, %v1150_v29  ;;  %v1192_v42 = vrot.slane %v1191_v30, 4 }
 0x350   : > { %v1165_v41 = vadd.f32 %v1164_v39, %v1163_v36  ;;  %v1203_v52 = vpop.permute.xlu1 %1202 }
 0x351   : > { %1153 = vst.msk [vmem:[#allocation3 + $0x1] sm:$0x1] %vm1137_vm3, %v1152_v31  ;;  %v1193_v43 = vadd.f32 %v1192_v42, %v1191_v30  ;;  %v1205_v44 = vmul.f32 %v1203_v52, %v2695_v16 }
 0x352   : > { %v1166_v47 = vrot.slane %v1165_v41, 1 }
 0x353   : > { %v1194_v54 = vrot.slane %v1193_v43, 2  ;;  %v1206_v18 = vsel %vm589_vm2, %v1205_v44, 0.0 }
 0x354   : > { %v1167_v19 = vadd.f32 %v1166_v47, %v1165_v41  ;;  %v1207_v59 = vrot.slane %v1206_v18, 4 }
 0x355   : > { %v1195_v6 = vadd.f32 %v1194_v54, %v1193_v43  ;;  %v1233_v37 = vpop.permute.xlu1 %1232 }
 0x356   : > { %1168 = vst.msk [vmem:[#allocation3 + $0x2] sm:$0x1] %vm1137_vm3, %v1167_v19  ;;  %v1208_v22 = vadd.f32 %v1207_v59, %v1206_v18 }
 0x357   : > { %v1196_v23 = vrot.slane %v1195_v6, 1 }
 0x358   : > { %v1209_v5 = vrot.slane %v1208_v22, 2 }
 0x359   : > { %v1197_v60 = vadd.f32 %v1196_v23, %v1195_v6 }
 0x35a   : > { %v1210_v50 = vadd.f32 %v1209_v5, %v1208_v22  ;;  %v1531_v35 = vpop.permute.xlu1 %1530 }
 0x35b   : > { %1198 = vst.msk [vmem:[#allocation3 + $0x4] sm:$0x1] %vm1137_vm3, %v1197_v60  ;;  %v1533_v16 = vmul.f32 %v1531_v35, %v2607_v48 }
 0x35c   : > { %v1211_v61 = vrot.slane %v1210_v50, 1 }
 0x35d   : > { %v1534_v62 = vsel %vm589_vm2, %v1533_v16, 0.0 }
 0x35e   : > { %v1212_v0 = vadd.f32 %v1211_v61, %v1210_v50  ;;  %v1535_v1 = vrot.slane %v1534_v62, 4 }
 0x35f   : > { %v1546_v4 = vpop.permute.xlu1 %1545 }
 0x360   : > { %1213 = vst.msk [vmem:[#allocation3 + $0x5] sm:$0x1] %vm1137_vm3, %v1212_v0  ;;  %v1536_v63 = vadd.f32 %v1535_v1, %v1534_v62  ;;  %v1548_v53 = vmul.f32 %v1546_v4, %v2626_v3 }
 0x362   : > { %v1537_v28 = vrot.slane %v1536_v63, 2  ;;  %v1549_v32 = vsel %vm589_vm2, %v1548_v53, 0.0  ;;  %v1661_v53 = vpop.permute.xlu0 %1660 }
 0x363   : > { %v1550_v8 = vrot.slane %v1549_v32, 4 }
 0x364   : > { %v1538_v10 = vadd.f32 %v1537_v28, %v1536_v63  ;;  %v1576_v11 = vpop.permute.xlu1 %1575 }
 0x365   : > { %v1551_v12 = vadd.f32 %v1550_v8, %v1549_v32  ;;  %v1578_v48 = vmul.f32 %v1576_v11, %v2653_v58  ;;  %v1073_v58 = vcombine.high %v2685_v56, %v2685_v56 }
 0x366   : > { %v1539_v2 = vrot.slane %v1538_v10, 1 }
 0x367   : > { %v1552_v13 = vrot.slane %v1551_v12, 2  ;;  %v1579_v14 = vsel %vm589_vm2, %v1578_v48, 0.0  ;;  %v1105_v30 = vrot.slane %v1073_v58, %v2390_v49 }
 0x368   : > { %v1540_v15 = vadd.f32 %v1539_v2, %v1538_v10  ;;  %v1580_v17 = vrot.slane %v1579_v14, 4  ;;  %v2247_v10 = vld [vmem:[#allocation2 + $0x8] sm:$0xff] }
 0x369   : > { %v1553_v21 = vadd.f32 %v1552_v13, %v1551_v12  ;;  %v1591_v24 = vpop.permute.xlu1 %1590  ;;  %v2248_v12 = vld [vmem:[#allocation2] sm:$0xff] }
 0x36a   : > { %1541 = vst.msk [vmem:[#allocation3 + $0x9] sm:$0x1] %vm1137_vm3, %v1540_v15  ;;  %v1581_v3 = vadd.f32 %v1580_v17, %v1579_v14  ;;  %v1593_v51 = vmul.f32 %v1591_v24, %v2662_v9  ;;  %v1788_v14 = vld [vmem:[%s2794_s6] sm:$0xff] (!%p1968_p5)  ;;  %v1789_v15 = vld [vmem:[%s2794_s6 + $0x8] sm:$0xff] (!%p1968_p5)  ;;  %v1791_v24 = vld [vmem:[%s2794_s6 + $0x18] sm:$0xff] (!%p1968_p5) }
 0x36b   : > { %v1554_v45 = vrot.slane %v1553_v21, 1  ;;  %v2132_v17 = vpack.c.bf16 (!%p1968_p5), %v1789_v15, %v1788_v14 }
 0x36c   : > { %v1582_v40 = vrot.slane %v1581_v3, 2  ;;  %v1594_v27 = vsel %vm589_vm2, %v1593_v51, 0.0 }
 0x36d   : > { %v1555_v26 = vadd.f32 %v1554_v45, %v1553_v21  ;;  %v1595_v20 = vrot.slane %v1594_v27, 4  ;;  %2133 = vmatprep.subr.bf16.mxu0 (!%p1968_p5), %v2132_v17  ;;  %v1790_v21 = vld [vmem:[%s2794_s6 + $0x10] sm:$0xff] (!%p1968_p5) }
 0x36e   : > { %v1583_v29 = vadd.f32 %v1582_v40, %v1581_v3  ;;  %v1621_v33 = vpop.permute.xlu1 %1620  ;;  %2135 = vmatpush3.bf16.msra.mxu0 (!%p1968_p5), %v2132_v17  ;;  %v2136_v3 = vpack.c.bf16 (!%p1968_p5), %v1791_v24, %v1790_v21 }
 0x36f   : > { %1556 = vst.msk [vmem:[#allocation3 + $0xa] sm:$0x1] %vm1137_vm3, %v1555_v26  ;;  %v1596_v36 = vadd.f32 %v1595_v20, %v1594_v27  ;;  %v1623_v38 = vmul.f32 %v1621_v33, %v2713_v7 }
 0x370   : > { %v1584_v34 = vrot.slane %v1583_v29, 1  ;;  %2137 = vmatprep.subr.bf16.mxu0 (!%p1968_p5), %v2136_v3 }
 0x371   : > { %v1597_v39 = vrot.slane %v1596_v36, 2  ;;  %v1624_v9 = vsel %vm589_vm2, %v1623_v38, 0.0 }
 0x372   : > { %v1585_v31 = vadd.f32 %v1584_v34, %v1583_v29  ;;  %v1625_v42 = vrot.slane %v1624_v9, 4  ;;  %v1023_v41 = vpop.permute.xlu1 %1022  ;;  %2139 = vmatpush3.bf16.msra.mxu0 (!%p1968_p5), %v2136_v3  ;;  %v1969_v29 = vld [vmem:[%s2793_s5] ss:$0 sm:$0xff] (!%p1968_p5) }
 0x373   : > { %v1598_v52 = vadd.f32 %v1597_v39, %v1596_v36  ;;  %v1121_v43 = vmul.f32 %v1105_v30, %v1023_v41 }
 0x374   : > { %1586 = vst.msk [vmem:[#allocation3 + $0xc] sm:$0x1] %vm1137_vm3, %v1585_v31  ;;  %v1626_v56 = vadd.f32 %v1625_v42, %v1624_v9 }
 0x375   : > { %v1599_v44 = vrot.slane %v1598_v52, 1  ;;  %v1230_v47 = vadd.f32 %v2704_v46, %v1121_v43  ;;  %v2246_v46 = vld [vmem:[%s2350_s17 + $0x18] sm:$0xff] }
 0x376   : > { %v1627_v54 = vrot.slane %v1626_v56, 2  ;;  %v1659_v63 = vpop.permute.xlu1 %1658 }
 0x377   : > { %v1600_v7 = vadd.f32 %v1599_v44, %v1598_v52  ;;  %v1235_v18 = vmul.f32 %v1233_v37, %v1230_v47  ;;  %v1637_v37 = vrot.slane %v2246_v46, %v2483_v25 }
 0x378   : > { %v1628_v19 = vadd.f32 %v1627_v54, %v1626_v56 }
 0x379   : > { %1601 = vst.msk [vmem:[#allocation3 + $0xd] sm:$0x1] %vm1137_vm3, %v1600_v7  ;;  %v1236_v49 = vsel %vm589_vm2, %v1235_v18, 0.0  ;;  %v1639_v61 = vmul.f32 %v1637_v37, %v2433_v57  ;;  %v1638_v62 = vmul.f32 %v1637_v37, %v2431_v55 }
 0x37a   : > { %v1629_v59 = vrot.slane %v1628_v19, 1  ;;  %v1237_v6 = vrot.slane %v1236_v49, 4 }
 0x37c   : > { %v1630_v22 = vadd.f32 %v1629_v59, %v1628_v19  ;;  %v1238_v23 = vadd.f32 %v1237_v6, %v1236_v49 }
 0x37e   : > { %1631 = vst.msk [vmem:[#allocation3 + $0xf] sm:$0x1] %vm1137_vm3, %v1630_v22  ;;  %v1239_v5 = vrot.slane %v1238_v23, 2 }
 0x380   : > { %v1240_v60 = vadd.f32 %v1239_v5, %v1238_v23 }
 0x382   : > { %v1241_v50 = vrot.slane %v1240_v60, 1 }
 0x384   : > { %v1242_v35 = vadd.f32 %v1241_v50, %v1240_v60 }
 0x385   : > { %v1633_v16 = vld [vmem:[#allocation3 + $0x8] sm:$0xff] }
 0x386   : > { %1243 = vst.msk [vmem:[#allocation3 + $0x7] sm:$0x1] %vm1137_vm3, %v1242_v35  ;;  %v1641_v1 = vadd.f32 %v1639_v61, %v1633_v16 }
 0x388   : > { %v1665_v32 = vmul.f32 %v1661_v53, %v1641_v1 }
 0x38d   : > { %v1632_v0 = vld [vmem:[#allocation3] sm:$0xff] }
 0x38e   : > { %v1640_v4 = vadd.f32 %v1638_v62, %v1632_v0 }
 0x390   : > { %v1664_v28 = vmul.f32 %v1659_v63, %v1640_v4 }
 0x392   : > { %2074 = vmatprep.mubr.msk.f32.mxu1 %vm589_vm2, %v1664_v28 }
 0x393   : > { %2075 = vmatmul.mubr.msk.f32.vlgmr.msra.gmra.mrb[2].mxu1 %vm589_vm2, %v1665_v32 }
 0x464   : > { %1762 = sbr.rel (%p1968_p5) target bundleno = 1512 (0x5e8), region = 56 }
 0x466   : > { %v2076_v8 = vpop.f32.mrb[2].mxu1 }
 0x467   : > { %v1756_v11 = vadd.f32 %v2247_v10, %v2076_v8  ;;  %v1746_v25 = vpop.f32.mrb[3].mxu1 }
 0x468   : > { %v1755_v48 = vadd.f32 %v2248_v12, %v1746_v25 }
 0x469   : > { %1758 = vst.msk [vmem:[#allocation2 + $0x8] sm:$0xff] %vm341_vm1, %v1756_v11  ;;  %v1764_v57 = vmul.f32 (!%p1968_p5), %v1756_v11, %v1756_v11 }
 0x46a   : > { %1757 = vst.msk [vmem:[#allocation2] sm:$0xff] %vm341_vm1, %v1755_v48  ;;  %v1763_v55 = vmul.f32 (!%p1968_p5), %v1755_v48, %v1755_v48 }
 0x46b   : > { %v1768_v13 = vsel %vm341_vm1, %v1764_v57, 0.0 }
 0x46c   : > { %v1765_v2 = vsel %vm341_vm1, %v1763_v55, 0.0 }
 0x46d   : > { %1766 = vadd.xlane.f32.xlu0 %v1765_v2 }
 0x471   : > { %1769 = vadd.xlane.f32.xlu0 %v1768_v13 }
 0x4fa   : > { %v1767_v51 = vpop.xlane.xlu0 %1766 }
 0x4fb   : > { %v1771_v45 = vmul.f32 0.03125, %v1767_v51 }
 0x4fd   : > { %v1773_v40 = vadd.f32 1e-05, %v1771_v45 }
 0x4fe   : > { %v1770_v27 = vpop.xlane.xlu0 %1769 }
 0x4ff   : > { %2249 = vrsqrt.f32 %v1773_v40  ;;  %v1772_v26 = vmul.f32 0.03125, %v1770_v27 }
 0x501   : > { %v1774_v20 = vadd.f32 1e-05, %v1772_v26 }
 0x503   : > { %2251 = vrsqrt.f32 %v1774_v20 }
 0x509   : > { %v2250_v58 = vpop.eup %2249 }
 0x50a   : > { %v1777_v33 = vmul.f32 %v2250_v58, %v1755_v48 }
 0x50c   : > { %v1786_v36 = vmul.f32 %v1969_v29, %v1777_v33 }
 0x50d   : > { %v2252_v38 = vpop.eup %2251 }
 0x50e   : > { %v1778_v34 = vmul.f32 %v2252_v38, %v1756_v11  ;;  %2085 = vmatprep.mubr.msk.f32.mxu0 %vm341_vm1, %v1786_v36 }
 0x510   : > { %v1787_v39 = vmul.f32 %v1969_v29, %v1778_v34 }
 0x512   : > { %2086 = vmatmul.mubr.msk.f32.vlgmr.msra.gmra.mrb[0].mxu0 %vm341_vm1, %v1787_v39 }
 0x5e5   : > { %v2087_v9 = vpop.f32.mrb[0].mxu0 }
 0x5e6   : > { %1874 = vst [vmem:[%s2795_s7 + $0x8] sm:$0xff] %v2087_v9  ;;  %v1864_v30 = vpop.f32.mrb[1].mxu0 }
 0x5e7   : > { %1873 = vst [vmem:[%s2795_s7] sm:$0xff] %v1864_v30 }
 0x5e8 PF: > { %s17_s24 = sadd.s32 1, %s2259_s24  }
 0x5e9   : > { %p14_p6 = scmp.ge.s32.totalorder %s17_s24, 4  }
 0x5eb   :  { %16 = sbr.rel (!%p14_p6) target bundleno = 1 (0x1), region = 91 }

</bundles_post_ra>
